<compile_context>
chip_gen: v7x
topology: tpu7x:2x2x1
jax: 0.10.0
libtpu: 0.0.40
codegen_flags: <defaults>
</compile_context>

<pallas_src>
import jax
import jax.numpy as jnp
from jax.experimental import pallas as pl
from jax.experimental.pallas import tpu as pltpu


def generator_kernel(x_ref,
                     w1_ref, b1_ref,
                     w2_ref, b2_ref,
                     w3_ref, b3_ref,
                     w4_ref, b4_ref,
                     w5_ref, b5_ref,
                     o_ref):
    # Layer 1: bf16 x bf16 -> f32 accumulate on the MXU; bias/ReLU in f32.
    h = jnp.dot(x_ref[...], w1_ref[...], preferred_element_type=jnp.float32)
    h = jnp.maximum(h + b1_ref[...], 0.0)
    # Layer 2
    h = jnp.dot(h.astype(jnp.bfloat16), w2_ref[...],
                preferred_element_type=jnp.float32)
    h = jnp.maximum(h + b2_ref[...], 0.0)
    # Layer 3
    h = jnp.dot(h.astype(jnp.bfloat16), w3_ref[...],
                preferred_element_type=jnp.float32)
    h = jnp.maximum(h + b3_ref[...], 0.0)
    # Layer 4
    h = jnp.dot(h.astype(jnp.bfloat16), w4_ref[...],
                preferred_element_type=jnp.float32)
    h = jnp.maximum(h + b4_ref[...], 0.0)
    # Layer 5: Linear + Sigmoid.  sigmoid(z) = 0.5*(tanh(0.5*z)+1): exactly one
    # EUP transcendental (tanh), exact result, off the MXU critical path.
    z = jnp.dot(h.astype(jnp.bfloat16), w5_ref[...],
                preferred_element_type=jnp.float32) + b5_ref[...]
    o_ref[...] = (0.5 * (jnp.tanh(0.5 * z) + 1.0)).astype(o_ref.dtype)


def _round_up(x, m):
    return -(-x // m) * m


def _choose_block_b(B):
    """Batch tile: big enough to amortize per-step overhead, >=2 steps when
    the batch is large (so v7x megacore can use both TensorCores), capped at
    1024 rows to stay comfortably inside 32 MiB VMEM on every generation."""
    if B <= 128:
        return _round_up(B, 8)              # single grid step, sublane-aligned
    return min(1024, _round_up(pl.cdiv(B, 2), 128))


def prepare_params(params):
    """One-time cast: weights -> bf16 (MXU operand dtype, half HBM traffic),
    biases -> f32 row vectors.  Do this once at init, NOT per forward call."""
    prepared = []
    for w, b in params:
        prepared.append((jnp.asarray(w, jnp.bfloat16),
                         jnp.asarray(b, jnp.float32).reshape(1, -1)))
    return prepared


def generator_forward(x, prepared_params, *, block_b=None):
    """x: (B, input_size) f32.  prepared_params: output of prepare_params."""
    B, in_features = x.shape
    out_features = prepared_params[-1][0].shape[1]

    if block_b is None:
        block_b = _choose_block_b(B)
    n_blocks = pl.cdiv(B, block_b)
    Bp = n_blocks * block_b

    # bf16 activations into the first matmul; zero-pad batch to the tile size.
    xp = x.astype(jnp.bfloat16)
    if Bp != B:
        xp = jnp.pad(xp, ((0, Bp - B), (0, 0)))

    flat_params = []
    in_specs = [pl.BlockSpec((block_b, in_features), lambda i: (i, 0))]
    for w, b in prepared_params:
        flat_params.extend([w, b])
        # Constant block index -> weights/biases stay VMEM-resident across the
        # whole batch grid (no re-DMA per step).
        in_specs.append(pl.BlockSpec(w.shape, lambda i: (0, 0)))
        in_specs.append(pl.BlockSpec(b.shape, lambda i: (0, 0)))

    flops = 2 * Bp * sum(w.shape[0] * w.shape[1] for w, _ in prepared_params)
    bytes_accessed = (
        xp.size * 2
        + sum(w.size * 2 + b.size * 4 for w, b in prepared_params)
        + Bp * out_features * 4
    )

    out = pl.pallas_call(
        generator_kernel,
        out_shape=jax.ShapeDtypeStruct((Bp, out_features), jnp.float32),
        grid=(n_blocks,),
        in_specs=in_specs,
        out_specs=pl.BlockSpec((block_b, out_features), lambda i: (i, 0)),
        compiler_params=pltpu.CompilerParams(
            dimension_semantics=("parallel",),   # v7x: shard batch tiles over 2 TCs
            vmem_limit_bytes=32 * 1024 * 1024,   # ~14 MiB peak @ block_b=1024; safe on v7x
        ),
        cost_estimate=pl.CostEstimate(
            flops=flops,
            transcendentals=Bp * out_features,
            bytes_accessed=bytes_accessed,
        ),
    )(xp, *flat_params)
    return out[:B]


def init_linear(key, fan_in, fan_out):
    """Deterministic init mimicking nn.Linear default (U[-1/sqrt(in), 1/sqrt(in)])."""
    kw, kb = jax.random.split(key)
    bound = 1.0 / jnp.sqrt(jnp.float32(fan_in))
    w = jax.random.uniform(kw, (fan_in, fan_out), jnp.float32, -bound, bound)
    b = jax.random.uniform(kb, (1, fan_out), jnp.float32, -bound, bound)
    return w, b


def reference_forward(x, prepared_params):
    """Pure-JAX reference with the same mixed precision as the kernel."""
    h = x.astype(jnp.bfloat16)
    for i, (w, b) in enumerate(prepared_params):
        z = jnp.dot(h, w, preferred_element_type=jnp.float32) + b
        if i < len(prepared_params) - 1:
            h = jnp.maximum(z, 0.0).astype(jnp.bfloat16)
        else:
            h = jax.nn.sigmoid(z)
    return h


if __name__ == "__main__":
    input_size = 64     # latent dim
    output_size = 256   # e.g. a small flattened image
    batch = 8

    key = jax.random.PRNGKey(0)
    keys = jax.random.split(key, 6)

    sizes = [(input_size, 128), (128, 256), (256, 512), (512, 1024),
             (1024, output_size)]
    params = [init_linear(keys[i + 1], fi, fo) for i, (fi, fo) in enumerate(sizes)]
    prepared = prepare_params(params)   # bf16 weight cast happens ONCE, here

    x = jax.random.normal(keys[0], (batch, input_size), jnp.float32)

    out = jax.block_until_ready(generator_forward(x, prepared))
    ref = reference_forward(x, prepared)

    assert out.shape == (batch, output_size)
    # bf16 matmul operands; sigmoid is exact now -> tighter tolerance than before.
    assert jnp.allclose(out, ref, atol=5e-3, rtol=5e-3), "mismatch vs. JAX reference"

    print("KERNEL_OK")
</pallas_src>

<mosaic_0001>
module attributes {stable_mosaic.version = 11 : i64} {
  func.func @generator_kernel(%arg0: i32, %arg1: memref<8x64xbf16, #tpu.memory_space<vmem>>, %arg2: memref<64x128xbf16, #tpu.memory_space<vmem>>, %arg3: memref<1x128xf32, #tpu.memory_space<vmem>>, %arg4: memref<128x256xbf16, #tpu.memory_space<vmem>>, %arg5: memref<1x256xf32, #tpu.memory_space<vmem>>, %arg6: memref<256x512xbf16, #tpu.memory_space<vmem>>, %arg7: memref<1x512xf32, #tpu.memory_space<vmem>>, %arg8: memref<512x1024xbf16, #tpu.memory_space<vmem>>, %arg9: memref<1x1024xf32, #tpu.memory_space<vmem>>, %arg10: memref<1024x256xbf16, #tpu.memory_space<vmem>>, %arg11: memref<1x256xf32, #tpu.memory_space<vmem>>, %arg12: memref<8x256xf32, #tpu.memory_space<vmem>>) attributes {dimension_semantics = [#tpu.dimension_semantics<parallel>], iteration_bounds = array<i64: 1>, scalar_prefetch = 0 : i64, scratch_operands = 0 : i64, tpu.core_type = #tpu.core_type<tc>, window_params = [{transform_indices = @transform_0, window_bounds = array<i64: 8, 64>}, {pipeline_mode = #tpu.pipeline_mode<synchronous>, transform_indices = @transform_1, window_bounds = array<i64: 64, 128>}, {pipeline_mode = #tpu.pipeline_mode<synchronous>, transform_indices = @transform_2, window_bounds = array<i64: 1, 128>}, {pipeline_mode = #tpu.pipeline_mode<synchronous>, transform_indices = @transform_3, window_bounds = array<i64: 128, 256>}, {pipeline_mode = #tpu.pipeline_mode<synchronous>, transform_indices = @transform_4, window_bounds = array<i64: 1, 256>}, {pipeline_mode = #tpu.pipeline_mode<synchronous>, transform_indices = @transform_5, window_bounds = array<i64: 256, 512>}, {pipeline_mode = #tpu.pipeline_mode<synchronous>, transform_indices = @transform_6, window_bounds = array<i64: 1, 512>}, {pipeline_mode = #tpu.pipeline_mode<synchronous>, transform_indices = @transform_7, window_bounds = array<i64: 512, 1024>}, {pipeline_mode = #tpu.pipeline_mode<synchronous>, transform_indices = @transform_8, window_bounds = array<i64: 1, 1024>}, {pipeline_mode = #tpu.pipeline_mode<synchronous>, transform_indices = @transform_9, window_bounds = array<i64: 1024, 256>}, {pipeline_mode = #tpu.pipeline_mode<synchronous>, transform_indices = @transform_10, window_bounds = array<i64: 1, 256>}, {transform_indices = @transform_11, window_bounds = array<i64: 8, 256>}]} {
    %c0 = arith.constant 0 : index
    %c0_0 = arith.constant 0 : index
    %0 = vector.load %arg1[%c0, %c0_0] : memref<8x64xbf16, #tpu.memory_space<vmem>>, vector<8x64xbf16>
    %c0_1 = arith.constant 0 : index
    %c0_2 = arith.constant 0 : index
    %1 = vector.load %arg2[%c0_1, %c0_2] : memref<64x128xbf16, #tpu.memory_space<vmem>>, vector<64x128xbf16>
    %cst = arith.constant dense<0.000000e+00> : vector<8x128xf32>
    %2 = tpu.matmul %0, %1, %cst {dimension_numbers = #tpu.dot_dimension_numbers<[1], [0], [0], [1], [0, 0, 1, 1], [], []>} : vector<8x64xbf16>, vector<64x128xbf16>, vector<8x128xf32> -> vector<8x128xf32>
    %c0_3 = arith.constant 0 : index
    %c0_4 = arith.constant 0 : index
    %3 = vector.load %arg3[%c0_3, %c0_4] : memref<1x128xf32, #tpu.memory_space<vmem>>, vector<1x128xf32>
    %4 = vector.broadcast %3 : vector<1x128xf32> to vector<8x128xf32>
    %5 = arith.addf %2, %4 : vector<8x128xf32>
    %cst_5 = arith.constant 0.000000e+00 : f32
    %6 = vector.broadcast %cst_5 : f32 to vector<8x128xf32>
    %7 = arith.maximumf %5, %6 : vector<8x128xf32>
    %8 = arith.truncf %7 : vector<8x128xf32> to vector<8x128xbf16>
    %c0_6 = arith.constant 0 : index
    %c0_7 = arith.constant 0 : index
    %9 = vector.load %arg4[%c0_6, %c0_7] : memref<128x256xbf16, #tpu.memory_space<vmem>>, vector<128x256xbf16>
    %cst_8 = arith.constant dense<0.000000e+00> : vector<8x256xf32>
    %10 = tpu.matmul %8, %9, %cst_8 {dimension_numbers = #tpu.dot_dimension_numbers<[1], [0], [0], [1], [0, 0, 1, 1], [], []>} : vector<8x128xbf16>, vector<128x256xbf16>, vector<8x256xf32> -> vector<8x256xf32>
    %c0_9 = arith.constant 0 : index
    %c0_10 = arith.constant 0 : index
    %11 = vector.load %arg5[%c0_9, %c0_10] : memref<1x256xf32, #tpu.memory_space<vmem>>, vector<1x256xf32>
    %12 = vector.broadcast %11 : vector<1x256xf32> to vector<8x256xf32>
    %13 = arith.addf %10, %12 : vector<8x256xf32>
    %cst_11 = arith.constant 0.000000e+00 : f32
    %14 = vector.broadcast %cst_11 : f32 to vector<8x256xf32>
    %15 = arith.maximumf %13, %14 : vector<8x256xf32>
    %16 = arith.truncf %15 : vector<8x256xf32> to vector<8x256xbf16>
    %c0_12 = arith.constant 0 : index
    %c0_13 = arith.constant 0 : index
    %17 = vector.load %arg6[%c0_12, %c0_13] : memref<256x512xbf16, #tpu.memory_space<vmem>>, vector<256x512xbf16>
    %cst_14 = arith.constant dense<0.000000e+00> : vector<8x512xf32>
    %18 = tpu.matmul %16, %17, %cst_14 {dimension_numbers = #tpu.dot_dimension_numbers<[1], [0], [0], [1], [0, 0, 1, 1], [], []>} : vector<8x256xbf16>, vector<256x512xbf16>, vector<8x512xf32> -> vector<8x512xf32>
    %c0_15 = arith.constant 0 : index
    %c0_16 = arith.constant 0 : index
    %19 = vector.load %arg7[%c0_15, %c0_16] : memref<1x512xf32, #tpu.memory_space<vmem>>, vector<1x512xf32>
    %20 = vector.broadcast %19 : vector<1x512xf32> to vector<8x512xf32>
    %21 = arith.addf %18, %20 : vector<8x512xf32>
    %cst_17 = arith.constant 0.000000e+00 : f32
    %22 = vector.broadcast %cst_17 : f32 to vector<8x512xf32>
    %23 = arith.maximumf %21, %22 : vector<8x512xf32>
    %24 = arith.truncf %23 : vector<8x512xf32> to vector<8x512xbf16>
    %c0_18 = arith.constant 0 : index
    %c0_19 = arith.constant 0 : index
    %25 = vector.load %arg8[%c0_18, %c0_19] : memref<512x1024xbf16, #tpu.memory_space<vmem>>, vector<512x1024xbf16>
    %cst_20 = arith.constant dense<0.000000e+00> : vector<8x1024xf32>
    %26 = tpu.matmul %24, %25, %cst_20 {dimension_numbers = #tpu.dot_dimension_numbers<[1], [0], [0], [1], [0, 0, 1, 1], [], []>} : vector<8x512xbf16>, vector<512x1024xbf16>, vector<8x1024xf32> -> vector<8x1024xf32>
    %c0_21 = arith.constant 0 : index
    %c0_22 = arith.constant 0 : index
    %27 = vector.load %arg9[%c0_21, %c0_22] : memref<1x1024xf32, #tpu.memory_space<vmem>>, vector<1x1024xf32>
    %28 = vector.broadcast %27 : vector<1x1024xf32> to vector<8x1024xf32>
    %29 = arith.addf %26, %28 : vector<8x1024xf32>
    %cst_23 = arith.constant 0.000000e+00 : f32
    %30 = vector.broadcast %cst_23 : f32 to vector<8x1024xf32>
    %31 = arith.maximumf %29, %30 : vector<8x1024xf32>
    %32 = arith.truncf %31 : vector<8x1024xf32> to vector<8x1024xbf16>
    %c0_24 = arith.constant 0 : index
    %c0_25 = arith.constant 0 : index
    %33 = vector.load %arg10[%c0_24, %c0_25] : memref<1024x256xbf16, #tpu.memory_space<vmem>>, vector<1024x256xbf16>
    %cst_26 = arith.constant dense<0.000000e+00> : vector<8x256xf32>
    %34 = tpu.matmul %32, %33, %cst_26 {dimension_numbers = #tpu.dot_dimension_numbers<[1], [0], [0], [1], [0, 0, 1, 1], [], []>} : vector<8x1024xbf16>, vector<1024x256xbf16>, vector<8x256xf32> -> vector<8x256xf32>
    %c0_27 = arith.constant 0 : index
    %c0_28 = arith.constant 0 : index
    %35 = vector.load %arg11[%c0_27, %c0_28] : memref<1x256xf32, #tpu.memory_space<vmem>>, vector<1x256xf32>
    %36 = vector.broadcast %35 : vector<1x256xf32> to vector<8x256xf32>
    %37 = arith.addf %34, %36 : vector<8x256xf32>
    %cst_29 = arith.constant 5.000000e-01 : f32
    %38 = vector.broadcast %cst_29 : f32 to vector<8x256xf32>
    %39 = arith.mulf %38, %37 : vector<8x256xf32>
    %40 = math.tanh %39 : vector<8x256xf32>
    %cst_30 = arith.constant 1.000000e+00 : f32
    %41 = vector.broadcast %cst_30 : f32 to vector<8x256xf32>
    %42 = arith.addf %40, %41 : vector<8x256xf32>
    %cst_31 = arith.constant 5.000000e-01 : f32
    %43 = vector.broadcast %cst_31 : f32 to vector<8x256xf32>
    %44 = arith.mulf %43, %42 : vector<8x256xf32>
    %c0_32 = arith.constant 0 : index
    %c0_33 = arith.constant 0 : index
    %45 = vector.load %arg12[%c0_32, %c0_33] : memref<8x256xf32, #tpu.memory_space<vmem>>, vector<8x256xf32>
    tpu.vector_store %arg12[%c0_32, %c0_33], %44 {strides = array<i32>} : memref<8x256xf32, #tpu.memory_space<vmem>>, vector<8x256xf32>,
    return
  }
  func.func @transform_0(%arg0: i32) -> (i32, i32) {
    %c0_i32 = arith.constant 0 : i32
    %c0_i32_0 = arith.constant 0 : i32
    return %arg0, %c0_i32 : i32, i32
  }
  func.func @transform_1(%arg0: i32) -> (i32, i32) {
    %c0_i32 = arith.constant 0 : i32
    %c0_i32_0 = arith.constant 0 : i32
    %c0_i32_1 = arith.constant 0 : i32
    return %c0_i32, %c0_i32_0 : i32, i32
  }
  func.func @transform_2(%arg0: i32) -> (i32, i32) {
    %c0_i32 = arith.constant 0 : i32
    %c0_i32_0 = arith.constant 0 : i32
    %c0_i32_1 = arith.constant 0 : i32
    return %c0_i32, %c0_i32_0 : i32, i32
  }
  func.func @transform_3(%arg0: i32) -> (i32, i32) {
    %c0_i32 = arith.constant 0 : i32
    %c0_i32_0 = arith.constant 0 : i32
    %c0_i32_1 = arith.constant 0 : i32
    return %c0_i32, %c0_i32_0 : i32, i32
  }
  func.func @transform_4(%arg0: i32) -> (i32, i32) {
    %c0_i32 = arith.constant 0 : i32
    %c0_i32_0 = arith.constant 0 : i32
    %c0_i32_1 = arith.constant 0 : i32
    return %c0_i32, %c0_i32_0 : i32, i32
  }
  func.func @transform_5(%arg0: i32) -> (i32, i32) {
    %c0_i32 = arith.constant 0 : i32
    %c0_i32_0 = arith.constant 0 : i32
    %c0_i32_1 = arith.constant 0 : i32
    return %c0_i32, %c0_i32_0 : i32, i32
  }
  func.func @transform_6(%arg0: i32) -> (i32, i32) {
    %c0_i32 = arith.constant 0 : i32
    %c0_i32_0 = arith.constant 0 : i32
    %c0_i32_1 = arith.constant 0 : i32
    return %c0_i32, %c0_i32_0 : i32, i32
  }
  func.func @transform_7(%arg0: i32) -> (i32, i32) {
    %c0_i32 = arith.constant 0 : i32
    %c0_i32_0 = arith.constant 0 : i32
    %c0_i32_1 = arith.constant 0 : i32
    return %c0_i32, %c0_i32_0 : i32, i32
  }
  func.func @transform_8(%arg0: i32) -> (i32, i32) {
    %c0_i32 = arith.constant 0 : i32
    %c0_i32_0 = arith.constant 0 : i32
    %c0_i32_1 = arith.constant 0 : i32
    return %c0_i32, %c0_i32_0 : i32, i32
  }
  func.func @transform_9(%arg0: i32) -> (i32, i32) {
    %c0_i32 = arith.constant 0 : i32
    %c0_i32_0 = arith.constant 0 : i32
    %c0_i32_1 = arith.constant 0 : i32
    return %c0_i32, %c0_i32_0 : i32, i32
  }
  func.func @transform_10(%arg0: i32) -> (i32, i32) {
    %c0_i32 = arith.constant 0 : i32
    %c0_i32_0 = arith.constant 0 : i32
    %c0_i32_1 = arith.constant 0 : i32
    return %c0_i32, %c0_i32_0 : i32, i32
  }
  func.func @transform_11(%arg0: i32) -> (i32, i32) {
    %c0_i32 = arith.constant 0 : i32
    %c0_i32_0 = arith.constant 0 : i32
    return %arg0, %c0_i32 : i32, i32
  }
}

</mosaic_0001>

<bundles_post_ra>
// kernel: tpu_custom_call.1
= control target key start
LH: loop header
LB: loop body
LE: loop exit
PB: predicated region body
PF: predicated region fallthrough
CT: control target
= control target key end

     0   :  { %16 = vsyncpa [#allocation3], 0  ;;  %s5066_s0 = inlined_call_operand.hbm [shape: bf16[8,64], index: 0, kind: input, shape index: {}]   ;;  %s5067_s1 = inlined_call_operand.hbm [shape: bf16[64,128], index: 1, kind: input, shape index: {}]   ;;  %s5068_s2 = inlined_call_operand.vmem [shape: f32[1,128], index: 2, kind: input, shape index: {}]   ;;  %s5069_s3 = inlined_call_operand.hbm [shape: bf16[128,256], index: 3, kind: input, shape index: {}]   ;;  %s5070_s4 = inlined_call_operand.vmem [shape: f32[1,256], index: 4, kind: input, shape index: {}]   ;;  %s5071_s5 = inlined_call_operand.hbm [shape: bf16[256,512], index: 5, kind: input, shape index: {}]   ;;  %s5072_s6 = inlined_call_operand.vmem [shape: f32[1,512], index: 6, kind: input, shape index: {}]   ;;  %s5073_s7 = inlined_call_operand.hbm [shape: bf16[512,1024], index: 7, kind: input, shape index: {}]   ;;  %s5074_s8 = inlined_call_operand.vmem [shape: f32[1,1024], index: 8, kind: input, shape index: {}]   ;;  %s5075_s9 = inlined_call_operand.hbm [shape: bf16[1024,256], index: 9, kind: input, shape index: {}]   ;;  %s5076_s10 = inlined_call_operand.vmem [shape: f32[1,256], index: 10, kind: input, shape index: {}]   ;;  %s5077_s11 = inlined_call_operand.hbm [shape: f32[8,256], index: 11, kind: output, shape index: {}]  }
   0x1   :  { %17 = vsyncpa [#allocation6], 0 }
   0x2   :  { %18 = vsyncpa [#allocation9], 0 }
   0x3   :  { %19 = vsyncpa [#allocation12], 0 }
   0x4   :  { %20 = vsyncpa [#allocation4], 0  ;;  %s4774_s17 = smov [#allocation5]   ;;  %s4610_s21 = scalar_lea.hbm %s5067_s1, 512 }
   0x5   :  { %s36_s18 = sshll.u32 %s4774_s17, 4  ;;  %p4611_p0 = scmp.ne.s32.totalorder %s5067_s1, %s4610_s21  ;;  %s37_s18 = int_to_ptr.vmem [resolvable:$true] %s36_s18 }
   0x6   :  { %p4614_p1 = scmp.lt.u32.totalorder %s4610_s21, %s5067_s1 }
   0x8   :  { %p4616_p2 = pnand %p4614_p1, %p4611_p0 }
   0xa   :  { %4619 = shalt.err (!%p4616_p2)
}
   0xb   :  { %s4620_s26 = scalar_lea.vmem %s37_s18, 512  ;;  %p4625_p4 = scmp.lt.s32.totalorder %s37_s18, %s37_s18 }
   0xc   :  { %p4621_p3 = scmp.ne.s32.totalorder %s37_s18, %s4620_s26  ;;  %p4626_p5 = scmp.lt.s32.totalorder %s4620_s26, %s4620_s26 }
   0xe   :  { %p4627_p6 = por %p4626_p5, %p4625_p4 }
  0x10   :  { %p4628_p7 = pnand %p4627_p6, %p4621_p3 }
  0x12   :  { %4631 = shalt.err (!%p4628_p7)
}
  0x13   :  { %s4775_s27 = smov 64   ;;  %s4776_s28 = smov 4  }
  0x14   :  { %42 = dma.hbm_to_vmem [thread:$0]  %s5067_s1, 512, %s37_s18, [#allocation6], %s4775_s27, %s4775_s27, %s4776_s28  }
  0x15   :  { %s4777_s12 = smov [#allocation8]   ;;  %s4632_s16 = scalar_lea.hbm %s5071_s5, 8192 }
  0x16   :  { %s64_s13 = sshll.u32 %s4777_s12, 4  ;;  %p4633_p8 = scmp.ne.s32.totalorder %s5071_s5, %s4632_s16  ;;  %s65_s13 = int_to_ptr.vmem [resolvable:$true] %s64_s13 }
  0x17   :  { %p4636_p9 = scmp.lt.u32.totalorder %s4632_s16, %s5071_s5 }
  0x19   :  { %p4638_p10 = pnand %p4636_p9, %p4633_p8 }
  0x1b   :  { %4641 = shalt.err (!%p4638_p10)
}
  0x1c   :  { %s4642_s22 = scalar_lea.vmem %s65_s13, 8192  ;;  %p4647_p12 = scmp.lt.s32.totalorder %s65_s13, %s65_s13 }
  0x1d   :  { %p4643_p11 = scmp.ne.s32.totalorder %s65_s13, %s4642_s22  ;;  %p4648_p13 = scmp.lt.s32.totalorder %s4642_s22, %s4642_s22 }
  0x1f   :  { %p4649_p0 = por %p4648_p13, %p4647_p12 }
  0x21   :  { %p4650_p1 = pnand %p4649_p0, %p4643_p11 }
  0x23   :  { %4653 = shalt.err (!%p4650_p1)
}
  0x24   :  { %s4778_s1 = smov 256   ;;  %s4779_s18 = smov 16  }
  0x25   :  { %70 = dma.hbm_to_vmem [thread:$0]  %s5071_s5, 8192, %s65_s13, [#allocation9], %s4778_s1, %s4778_s1, %s4779_s18  }
  0x26   :  { %s4780_s25 = smov [#allocation2]   ;;  %s4781_s27 = smov [#allocation7]  }
  0x27   :  { %s27_s26 = sshll.u32 %s4780_s25, 4  ;;  %s50_s28 = sshll.u32 %s4781_s27, 4  ;;  %s28_s26 = int_to_ptr.vmem [resolvable:$true] %s27_s26  ;;  %s4876_s28 = int_to_ptr.vmem [resolvable:$true] %s50_s28 }
  0x28   :  { %s4654_s12 = scalar_lea.hbm %s5066_s0, 64 }
  0x29   :  { %p4655_p2 = scmp.ne.s32.totalorder %s5066_s0, %s4654_s12  ;;  %p4658_p3 = scmp.lt.u32.totalorder %s4654_s12, %s5066_s0 }
  0x2b   :  { %p4660_p4 = pnand %p4658_p3, %p4655_p2 }
  0x2d   :  { %4663 = shalt.err (!%p4660_p4)
}
  0x2e   :  { %s4664_s5 = scalar_lea.vmem %s28_s26, 64  ;;  %p4669_p6 = scmp.lt.s32.totalorder %s28_s26, %s28_s26 }
  0x2f   :  { %p4665_p5 = scmp.ne.s32.totalorder %s28_s26, %s4664_s5  ;;  %p4670_p7 = scmp.lt.s32.totalorder %s4664_s5, %s4664_s5 }
  0x31   :  { %p4671_p8 = por %p4670_p7, %p4669_p6 }
  0x33   :  { %p4672_p9 = pnand %p4671_p8, %p4665_p5 }
  0x35   :  { %4675 = shalt.err (!%p4672_p9)
}
  0x36   :  { %30 = dma.hbm_to_vmem [thread:$0]  %s5066_s0, 64, %s28_s26, [#allocation3]  }
  0x37   :  { %s4676_s22 = scalar_lea.hbm %s5069_s3, 2048 }
  0x38   :  { %p4677_p10 = scmp.ne.s32.totalorder %s5069_s3, %s4676_s22  ;;  %p4680_p11 = scmp.lt.u32.totalorder %s4676_s22, %s5069_s3 }
  0x3a   :  { %p4682_p12 = pnand %p4680_p11, %p4677_p10 }
  0x3c   :  { %4685 = shalt.err (!%p4682_p12)
}
  0x3d   :  { %s4686_s25 = scalar_lea.vmem %s4876_s28, 2048  ;;  %p4691_p0 = scmp.lt.s32.totalorder %s4876_s28, %s4876_s28 }
  0x3e   :  { %p4687_p13 = scmp.ne.s32.totalorder %s4876_s28, %s4686_s25  ;;  %p4692_p1 = scmp.lt.s32.totalorder %s4686_s25, %s4686_s25 }
  0x40   :  { %p4693_p2 = por %p4692_p1, %p4691_p0 }
  0x42   :  { %p4694_p3 = pnand %p4693_p2, %p4687_p13 }
  0x44   :  { %4697 = shalt.err (!%p4694_p3)
}
  0x45   :  { %s4782_s0 = smov 128   ;;  %s4783_s26 = smov 8  }
  0x46   :  { %56 = dma.hbm_to_vmem [thread:$0]  %s5069_s3, 2048, %s4876_s28, [#allocation6], %s4782_s0, %s4782_s0, %s4783_s26  }
  0x47   :  { %s4784_s30 = smov [#allocation10]   ;;  %s4698_s16 = scalar_lea.hbm %s5073_s7, 32768 }
  0x48   :  { %s78_s12 = sshll.u32 %s4784_s30, 4  ;;  %p4699_p4 = scmp.ne.s32.totalorder %s5073_s7, %s4698_s16  ;;  %s79_s12 = int_to_ptr.vmem [resolvable:$true] %s78_s12 }
  0x49   :  { %p4702_p5 = scmp.lt.u32.totalorder %s4698_s16, %s5073_s7 }
  0x4b   :  { %p4704_p6 = pnand %p4702_p5, %p4699_p4 }
  0x4d   :  { %4707 = shalt.err (!%p4704_p6)
}
  0x4e   :  { %s4708_s20 = scalar_lea.vmem %s79_s12, 32768  ;;  %p4713_p8 = scmp.lt.s32.totalorder %s79_s12, %s79_s12 }
  0x4f   :  { %p4709_p7 = scmp.ne.s32.totalorder %s79_s12, %s4708_s20  ;;  %p4714_p9 = scmp.lt.s32.totalorder %s4708_s20, %s4708_s20 }
  0x51   :  { %p4715_p10 = por %p4714_p9, %p4713_p8 }
  0x53   :  { %p4716_p11 = pnand %p4715_p10, %p4709_p7 }
  0x55   :  { %4719 = shalt.err (!%p4716_p11)
}
  0x56   :  { %s4785_s3 = smov 512   ;;  %s4786_s28 = smov 32  }
  0x57   :  { %84 = dma.hbm_to_vmem [thread:$0]  %s5073_s7, 32768, %s79_s12, [#allocation9], %s4785_s3, %s4785_s3, %s4786_s28  }
  0x58   :  { %s4787_s1 = smov [#allocation11]   ;;  %s4720_s25 = scalar_lea.hbm %s5075_s9, 16384 }
  0x59   :  { %s92_s18 = sshll.u32 %s4787_s1, 4  ;;  %p4721_p12 = scmp.ne.s32.totalorder %s5075_s9, %s4720_s25  ;;  %s93_s18 = int_to_ptr.vmem [resolvable:$true] %s92_s18 }
  0x5a   :  { %p4724_p13 = scmp.lt.u32.totalorder %s4720_s25, %s5075_s9 }
  0x5c   :  { %p4726_p0 = pnand %p4724_p13, %p4721_p12 }
  0x5e   :  { %4729 = shalt.err (!%p4726_p0)
}
  0x5f   :  { %s4730_s15 = scalar_lea.vmem %s93_s18, 16384  ;;  %p4735_p2 = scmp.lt.s32.totalorder %s93_s18, %s93_s18 }
  0x60   :  { %p4731_p1 = scmp.ne.s32.totalorder %s93_s18, %s4730_s15  ;;  %p4736_p3 = scmp.lt.s32.totalorder %s4730_s15, %s4730_s15 }
  0x62   :  { %p4737_p4 = por %p4736_p3, %p4735_p2 }
  0x64   :  { %p4738_p5 = pnand %p4737_p4, %p4731_p1 }
  0x66   :  { %4741 = shalt.err (!%p4738_p5)
}
  0x67   :  { %98 = dma.hbm_to_vmem [thread:$0]  %s5075_s9, 16384, %s93_s18, [#allocation12], %s4782_s0, %s4782_s0, %s4783_s26  }
  0x68   :  { %4764 = dma.done.wait [#allocation3], 64  }
  0x69   :  { %4765 = vsyncadd [#allocation3], 4294967232 }
  0x6a   :  { %4766 = dma.done.wait [#allocation6], 2560  }
  0x6b   :  { %4767 = vsyncadd [#allocation6], 4294964736 }
  0x6c   :  { %4768 = dma.done.wait [#allocation9], 40960  }
  0x6d   :  { %4769 = vsyncadd [#allocation9], 4294926336 }
  0x6e   :  { %4770 = dma.done.wait [#allocation12], 16384  }
  0x6f   :  { %4771 = vsyncadd [#allocation12], 4294950912  ;;  %v4788_v0 = vmov 0.0   ;;  %vm4789_vm0 = vmmov 0   ;;  %v4290_v1 = vld [vmem:[#allocation5] sm:$0xff]   ;;  %v4291_v2 = vld [vmem:[#allocation5 + $0x8] sm:$0xff]  }
  0x70   :  { %4224 = vmatprep.subr.bf16.mxu0 %v4788_v0  ;;  %4232 = vmatprep.mubr.msk.bf16.mxu0 %vm4789_vm0, %v4788_v0  ;;  %v4294_v3 = vld [vmem:[#allocation7 + $0x4] ss:$8 sps:$4 sm:$0xff]   ;;  %v4296_v4 = vld [vmem:[#allocation7] ss:$8 sps:$4 sm:$0xff]   ;;  %v4292_v5 = vld [vmem:[#allocation5 + $0x10] sm:$0xff]   ;;  %vm160_vm1 = vcmask 523264  }
  0x71   :  { %4225 = vmatpush3.bf16.msra.mxu0 %v4290_v1  ;;  %v4297_v6 = vld [vmem:[#allocation7 + $0x14] ss:$8 sps:$4 sm:$0xff]   ;;  %314 = vmatprep.subr.bf16.mxu1 %v4294_v3  ;;  %v4299_v7 = vld [vmem:[#allocation7 + $0x10] ss:$8 sps:$4 sm:$0xff]   ;;  %v4300_v8 = vld [vmem:[#allocation7 + $0x24] ss:$8 sps:$4 sm:$0xff]  }
  0x72   :  { %4226 = vmatprep.subr.bf16.mxu0 %v4788_v0  ;;  %315 = vmatpush1.bf16.msra.mxu1 %v4296_v4  ;;  %v4293_v9 = vld [vmem:[#allocation5 + $0x18] sm:$0xff]   ;;  %v4302_v10 = vld [vmem:[#allocation7 + $0x20] ss:$8 sps:$4 sm:$0xff]   ;;  %v4306_v14 = vld [vmem:[#allocation7 + $0x44] ss:$8 sps:$4 sm:$0xff]   ;;  %v4790_v22 = vmov 0  }
  0x73   :  { %316 = vmatprep.subr.bf16.mxu1 %v4297_v6  ;;  %v120_v11 = vld [vmem:[#allocation2] sm:$0xf]  ;;  %v4305_v13 = vld [vmem:[#allocation7 + $0x30] ss:$8 sps:$4 sm:$0xff]   ;;  %v4308_v15 = vld [vmem:[#allocation7 + $0x40] ss:$8 sps:$4 sm:$0xff]   ;;  %346 = vmatprep.mubr.bf16.mxu1 %v4790_v22 }
  0x74   :  { %v4303_v12 = vld [vmem:[#allocation7 + $0x34] ss:$8 sps:$4 sm:$0xff]   ;;  %v4311_v17 = vld [vmem:[#allocation7 + $0x50] ss:$8 sps:$4 sm:$0xff]   ;;  %v4312_v18 = vld [vmem:[#allocation7 + $0x64] ss:$8 sps:$4 sm:$0xff]  }
  0x75   :  { %4227 = vmatpush3.bf16.msra.mxu0 %v4291_v2  ;;  %v4309_v16 = vld [vmem:[#allocation7 + $0x54] ss:$8 sps:$4 sm:$0xff]   ;;  %v4314_v19 = vld [vmem:[#allocation7 + $0x60] ss:$8 sps:$4 sm:$0xff]   ;;  %v4317_v21 = vld [vmem:[#allocation7 + $0x70] ss:$8 sps:$4 sm:$0xff]  }
  0x76   :  { %4228 = vmatprep.subr.bf16.mxu0 %v4788_v0  ;;  %317 = vmatpush1.bf16.msra.mxu1 %v4299_v7  ;;  %v4315_v20 = vld [vmem:[#allocation7 + $0x74] ss:$8 sps:$4 sm:$0xff]   ;;  %v4318_v31 = vld [vmem:[#allocation8] ss:$16 sps:$4 sm:$0xff]   ;;  %s4791_s13 = smov [#allocation13]  }
  0x77   :  { %318 = vmatprep.subr.bf16.mxu1 %v4300_v8  ;;  %v4320_v23 = vld [vmem:[#allocation8 + $0x4] ss:$16 sps:$4 sm:$0xff]   ;;  %v4321_v34 = vld [vmem:[#allocation8 + $0x20] ss:$16 sps:$4 sm:$0xff]   ;;  %v4368_v63 = vld [vmem:[#allocation8 + $0xc] ss:$16 sps:$4 sm:$0xff]  }
  0x78   :  { %v3749_v24 = vld [vmem:[%s5068_s2] ss:$0 sm:$0xff]  ;;  %v4324_v36 = vld [vmem:[#allocation8 + $0x40] ss:$16 sps:$4 sm:$0xff]   ;;  %v4377_v22 = vld [vmem:[#allocation8 + $0x6c] ss:$16 sps:$4 sm:$0xff]  }
  0x79   :  { %4229 = vmatpush3.bf16.msra.mxu0 %v4292_v5  ;;  %v4323_v33 = vld [vmem:[#allocation8 + $0x24] ss:$16 sps:$4 sm:$0xff]   ;;  %v4327_v38 = vld [vmem:[#allocation8 + $0x60] ss:$16 sps:$4 sm:$0xff]   ;;  %s3737_s19 = sshll.u32 %s4791_s13, 4  ;;  %s3738_s19 = int_to_ptr.vmem [resolvable:$true] %s3737_s19 }
  0x7a   :  { %4230 = vmatprep.subr.bf16.mxu0 %v4788_v0  ;;  %319 = vmatpush1.bf16.msra.mxu1 %v4302_v10  ;;  %v4326_v35 = vld [vmem:[#allocation8 + $0x44] ss:$16 sps:$4 sm:$0xff]   ;;  %v4330_v40 = vld [vmem:[#allocation8 + $0x80] ss:$16 sps:$4 sm:$0xff]   ;;  %v224_v0 = vlaneseq  ;;  %p4747_p7 = scmp.lt.s32.totalorder %s3738_s19, %s3738_s19 }
  0x7b   :  { %320 = vmatprep.subr.bf16.mxu1 %v4303_v12  ;;  %v4329_v37 = vld [vmem:[#allocation8 + $0x64] ss:$16 sps:$4 sm:$0xff]   ;;  %v4333_v42 = vld [vmem:[#allocation8 + $0xa0] ss:$16 sps:$4 sm:$0xff]  }
  0x7c   :  { %v4332_v39 = vld [vmem:[#allocation8 + $0x84] ss:$16 sps:$4 sm:$0xff]   ;;  %v4336_v44 = vld [vmem:[#allocation8 + $0xc0] ss:$16 sps:$4 sm:$0xff]   ;;  %v4940_v1 = vshrl.u32 %v224_v0, 7 }
  0x7d   :  { %4231 = vmatpush3.bf16.msra.mxu0 %v4293_v9  ;;  %v4335_v41 = vld [vmem:[#allocation8 + $0xa4] ss:$16 sps:$4 sm:$0xff]   ;;  %v4339_v46 = vld [vmem:[#allocation8 + $0xe0] ss:$16 sps:$4 sm:$0xff]  }
  0x7e   :  { %321 = vmatpush1.bf16.msra.mxu1 %v4305_v13  ;;  %v4338_v43 = vld [vmem:[#allocation8 + $0xc4] ss:$16 sps:$4 sm:$0xff]   ;;  %v4342_v48 = vld [vmem:[#allocation8 + $0x100] ss:$16 sps:$4 sm:$0xff]   ;;  %v4943_v2 = vsub.s32 0, %v4940_v1  ;;  %v4949_v4 = vsub.s32 1, %v4940_v1 }
  0x7f   :  { %322 = vmatprep.subr.bf16.mxu1 %v4306_v14  ;;  %v4341_v45 = vld [vmem:[#allocation8 + $0xe4] ss:$16 sps:$4 sm:$0xff]   ;;  %v4345_v50 = vld [vmem:[#allocation8 + $0x120] ss:$16 sps:$4 sm:$0xff]  }
  0x80   :  { %4233 = vmatmul.mubr.msk.bf16.vlgmr.msra.gmra.mrb[0].mxu0 %vm160_vm1, %v120_v11  ;;  %v4344_v47 = vld [vmem:[#allocation8 + $0x104] ss:$16 sps:$4 sm:$0xff]   ;;  %v4348_v52 = vld [vmem:[#allocation8 + $0x140] ss:$16 sps:$4 sm:$0xff]  }
  0x81   :  { %v4347_v49 = vld [vmem:[#allocation8 + $0x124] ss:$16 sps:$4 sm:$0xff]   ;;  %v4351_v54 = vld [vmem:[#allocation8 + $0x160] ss:$16 sps:$4 sm:$0xff]  }
  0x82   :  { %323 = vmatpush1.bf16.msra.mxu1 %v4308_v15  ;;  %v4350_v51 = vld [vmem:[#allocation8 + $0x144] ss:$16 sps:$4 sm:$0xff]   ;;  %v4354_v56 = vld [vmem:[#allocation8 + $0x180] ss:$16 sps:$4 sm:$0xff]  }
  0x83   :  { %324 = vmatprep.subr.bf16.mxu1 %v4309_v16  ;;  %v4353_v53 = vld [vmem:[#allocation8 + $0x164] ss:$16 sps:$4 sm:$0xff]   ;;  %v4357_v58 = vld [vmem:[#allocation8 + $0x1a0] ss:$16 sps:$4 sm:$0xff]   ;;  %v4366_v16 = vld [vmem:[#allocation8 + $0x8] ss:$16 sps:$4 sm:$0xff]  }
  0x84   :  { %v4356_v55 = vld [vmem:[#allocation8 + $0x184] ss:$16 sps:$4 sm:$0xff]   ;;  %v4360_v60 = vld [vmem:[#allocation8 + $0x1c0] ss:$16 sps:$4 sm:$0xff]  }
  0x85   :  { %v4359_v57 = vld [vmem:[#allocation8 + $0x1a4] ss:$16 sps:$4 sm:$0xff]   ;;  %v4363_v62 = vld [vmem:[#allocation8 + $0x1e0] ss:$16 sps:$4 sm:$0xff]  }
  0x86   :  { %325 = vmatpush1.bf16.msra.mxu1 %v4311_v17  ;;  %v4362_v59 = vld [vmem:[#allocation8 + $0x1c4] ss:$16 sps:$4 sm:$0xff]  }
  0x87   :  { %326 = vmatprep.subr.bf16.mxu1 %v4312_v18  ;;  %v4365_v61 = vld [vmem:[#allocation8 + $0x1e4] ss:$16 sps:$4 sm:$0xff]   ;;  %v4371_v18 = vld [vmem:[#allocation8 + $0x2c] ss:$16 sps:$4 sm:$0xff]  }
  0x88   :  { %v222_v3 = vld [vmem:[%s5070_s4] sm:$0x3]  ;;  %v891_v0 = vld [vmem:[#allocation10 + $0x120] sm:$0xff] }
  0x89   :  { %v227_v5 = vrot.slane %v222_v3, %v4943_v2  ;;  %v231_v6 = vrot.slane %v222_v3, %v4949_v4 }
  0x8a   :  { %327 = vmatpush1.bf16.msra.mxu1 %v4314_v19  ;;  %v4369_v19 = vld [vmem:[#allocation8 + $0x28] ss:$16 sps:$4 sm:$0xff]  }
  0x8b   :  { %328 = vmatprep.subr.bf16.mxu1 %v4315_v20  ;;  %v4374_v20 = vld [vmem:[#allocation8 + $0x4c] ss:$16 sps:$4 sm:$0xff]  }
  0x8e   :  { %329 = vmatpush1.bf16.msra.mxu1 %v4317_v21  ;;  %v4372_v21 = vld [vmem:[#allocation8 + $0x48] ss:$16 sps:$4 sm:$0xff]  }
  0x8f   :  { %765 = vmatprep.subr.bf16.mxu1 %v4320_v23  ;;  %v4375_v23 = vld [vmem:[#allocation8 + $0x68] ss:$16 sps:$4 sm:$0xff]  }
 0x153   :  { %v198_v25 = vpop.f32.mrb[0].mxu0 }
 0x154   :  { %v199_v26 = vadd.f32 %v3749_v24, %v198_v25  ;;  %v4234_v27 = vpop.f32.mrb[1].mxu0  ;;  %v4380_v24 = vld [vmem:[#allocation8 + $0x8c] ss:$16 sps:$4 sm:$0xff]   ;;  %v4378_v25 = vld [vmem:[#allocation8 + $0x88] ss:$16 sps:$4 sm:$0xff]  }
 0x155   :  { %v201_v28 = vpop.f32.mrb[2].mxu0  ;;  %v4381_v27 = vld [vmem:[#allocation8 + $0xa8] ss:$16 sps:$4 sm:$0xff]  }
 0x156   :  { %v204_v29 = vmax.f32 %v199_v26, 0.0  ;;  %v4235_v30 = vpop.f32.mrb[3].mxu0  ;;  %v4383_v26 = vld [vmem:[#allocation8 + $0xac] ss:$16 sps:$4 sm:$0xff]  }
 0x157   :  { %v4386_v28 = vld [vmem:[#allocation8 + $0xcc] ss:$16 sps:$4 sm:$0xff]  }
 0x158   :  { %v205_v32 = vpack.c.bf16 %v204_v29, %v204_v29  ;;  %v4384_v29 = vld [vmem:[#allocation8 + $0xc8] ss:$16 sps:$4 sm:$0xff]   ;;  %v4389_v30 = vld [vmem:[#allocation8 + $0xec] ss:$16 sps:$4 sm:$0xff]  }
 0x15a   :  { %347 = vmatmul.mubr.bf16.vlgmr.msra.gmra.mrb[0].mxu1 %v205_v32  ;;  %v4392_v32 = vld [vmem:[#allocation8 + $0x10c] ss:$16 sps:$4 sm:$0xff]  }
 0x15b   :  { %766 = vmatpush1.bf16.msra.mxu1 %v4318_v31  ;;  %v4387_v31 = vld [vmem:[#allocation8 + $0xe8] ss:$16 sps:$4 sm:$0xff]  }
 0x15c   :  { %767 = vmatprep.subr.bf16.mxu1 %v4323_v33  ;;  %v4390_v33 = vld [vmem:[#allocation8 + $0x108] ss:$16 sps:$4 sm:$0xff]  }
 0x15f   :  { %768 = vmatpush1.bf16.msra.mxu1 %v4321_v34  ;;  %v4395_v34 = vld [vmem:[#allocation8 + $0x12c] ss:$16 sps:$4 sm:$0xff]  }
 0x160   :  { %769 = vmatprep.subr.bf16.mxu1 %v4326_v35  ;;  %v4393_v35 = vld [vmem:[#allocation8 + $0x128] ss:$16 sps:$4 sm:$0xff]  }
 0x163   :  { %770 = vmatpush1.bf16.msra.mxu1 %v4324_v36  ;;  %v4398_v36 = vld [vmem:[#allocation8 + $0x14c] ss:$16 sps:$4 sm:$0xff]  }
 0x164   :  { %771 = vmatprep.subr.bf16.mxu1 %v4329_v37  ;;  %v4396_v37 = vld [vmem:[#allocation8 + $0x148] ss:$16 sps:$4 sm:$0xff]  }
 0x167   :  { %772 = vmatpush1.bf16.msra.mxu1 %v4327_v38  ;;  %v4401_v38 = vld [vmem:[#allocation8 + $0x16c] ss:$16 sps:$4 sm:$0xff]  }
 0x168   :  { %773 = vmatprep.subr.bf16.mxu1 %v4332_v39  ;;  %v4399_v39 = vld [vmem:[#allocation8 + $0x168] ss:$16 sps:$4 sm:$0xff]  }
 0x16b   :  { %774 = vmatpush1.bf16.msra.mxu1 %v4330_v40  ;;  %v4404_v40 = vld [vmem:[#allocation8 + $0x18c] ss:$16 sps:$4 sm:$0xff]  }
 0x16c   :  { %775 = vmatprep.subr.bf16.mxu1 %v4335_v41  ;;  %v4402_v41 = vld [vmem:[#allocation8 + $0x188] ss:$16 sps:$4 sm:$0xff]  }
 0x16f   :  { %776 = vmatpush1.bf16.msra.mxu1 %v4333_v42  ;;  %v4407_v42 = vld [vmem:[#allocation8 + $0x1ac] ss:$16 sps:$4 sm:$0xff]  }
 0x170   :  { %777 = vmatprep.subr.bf16.mxu1 %v4338_v43  ;;  %v4405_v43 = vld [vmem:[#allocation8 + $0x1a8] ss:$16 sps:$4 sm:$0xff]  }
 0x173   :  { %778 = vmatpush1.bf16.msra.mxu1 %v4336_v44  ;;  %v4410_v44 = vld [vmem:[#allocation8 + $0x1cc] ss:$16 sps:$4 sm:$0xff]  }
 0x174   :  { %779 = vmatprep.subr.bf16.mxu1 %v4341_v45  ;;  %v4408_v45 = vld [vmem:[#allocation8 + $0x1c8] ss:$16 sps:$4 sm:$0xff]  }
 0x177   :  { %780 = vmatpush1.bf16.msra.mxu1 %v4339_v46  ;;  %v4413_v46 = vld [vmem:[#allocation8 + $0x1ec] ss:$16 sps:$4 sm:$0xff]  }
 0x178   :  { %781 = vmatprep.subr.bf16.mxu1 %v4344_v47  ;;  %v855_v47 = vld [vmem:[#allocation10] sm:$0xff] }
 0x17b   :  { %782 = vmatpush1.bf16.msra.mxu1 %v4342_v48  ;;  %v859_v48 = vld [vmem:[#allocation10 + $0x20] sm:$0xff] }
 0x17c   :  { %783 = vmatprep.subr.bf16.mxu1 %v4347_v49  ;;  %v4411_v49 = vld [vmem:[#allocation8 + $0x1e8] ss:$16 sps:$4 sm:$0xff]  }
 0x17f   :  { %784 = vmatpush1.bf16.msra.mxu1 %v4345_v50  ;;  %v3836_v50 = vcombine.high %v855_v47, %v859_v48 }
 0x180   :  { %785 = vmatprep.subr.bf16.mxu1 %v4350_v51  ;;  %v863_v51 = vld [vmem:[#allocation10 + $0x40] sm:$0xff] }
 0x183   :  { %786 = vmatpush1.bf16.msra.mxu1 %v4348_v52  ;;  %v867_v52 = vld [vmem:[#allocation10 + $0x60] sm:$0xff] }
 0x184   :  { %787 = vmatprep.subr.bf16.mxu1 %v4353_v53  ;;  %v3835_v53 = vcombine.low %v855_v47, %v859_v48  ;;  %v1007_v47 = vld [vmem:[#allocation10 + $0x4c0] sm:$0xff] }
 0x185   :  { %v1011_v48 = vld [vmem:[#allocation10 + $0x4e0] sm:$0xff] }
 0x187   :  { %788 = vmatpush1.bf16.msra.mxu1 %v4351_v54  ;;  %v3844_v54 = vcombine.high %v863_v51, %v867_v52 }
 0x188   :  { %789 = vmatprep.subr.bf16.mxu1 %v4356_v55  ;;  %v871_v55 = vld [vmem:[#allocation10 + $0x80] sm:$0xff] }
 0x18b   :  { %790 = vmatpush1.bf16.msra.mxu1 %v4354_v56  ;;  %v875_v56 = vld [vmem:[#allocation10 + $0xa0] sm:$0xff] }
 0x18c   :  { %791 = vmatprep.subr.bf16.mxu1 %v4359_v57  ;;  %v3843_v57 = vcombine.low %v863_v51, %v867_v52  ;;  %v3988_v51 = vcombine.high %v1007_v47, %v1011_v48 }
 0x18f   :  { %792 = vmatpush1.bf16.msra.mxu1 %v4357_v58  ;;  %v3852_v58 = vcombine.high %v871_v55, %v875_v56 }
 0x190   :  { %793 = vmatprep.subr.bf16.mxu1 %v4362_v59  ;;  %v879_v59 = vld [vmem:[#allocation10 + $0xc0] sm:$0xff] }
 0x193   :  { %794 = vmatpush1.bf16.msra.mxu1 %v4360_v60  ;;  %v883_v60 = vld [vmem:[#allocation10 + $0xe0] sm:$0xff] }
 0x194   :  { %795 = vmatprep.subr.bf16.mxu1 %v4365_v61  ;;  %v3851_v61 = vcombine.low %v871_v55, %v875_v56  ;;  %v3859_v3 = vcombine.low %v879_v59, %v883_v60  ;;  %v1015_v55 = vld [vmem:[#allocation10 + $0x500] sm:$0xff] }
 0x195   :  { %v1019_v56 = vld [vmem:[#allocation10 + $0x520] sm:$0xff] }
 0x197   :  { %796 = vmatpush1.bf16.msra.mxu1 %v4363_v62  ;;  %v3860_v62 = vcombine.high %v879_v59, %v883_v60  ;;  %v3996_v59 = vcombine.high %v1015_v55, %v1019_v56 }
 0x198   :  { %806 = vmatprep.subr.bf16.mxu1 %v4368_v63  ;;  %v887_v63 = vld [vmem:[#allocation10 + $0x100] sm:$0xff] }
 0x22d   :  { %v348_v7 = vpop.f32.mrb[0].mxu1 }
 0x22e   :  { %v349_v8 = vadd.f32 %v348_v7, %v227_v5  ;;  %v350_v9 = vpop.f32.mrb[1].mxu1  ;;  %v3868_v5 = vcombine.high %v887_v63, %v891_v0  ;;  %v899_v7 = vld [vmem:[#allocation10 + $0x160] sm:$0xff] }
 0x22f   :  { %v351_v10 = vadd.f32 %v350_v9, %v231_v6  ;;  %v352_v11 = vpop.f32.mrb[2].mxu1  ;;  %v895_v6 = vld [vmem:[#allocation10 + $0x140] sm:$0xff] }
 0x230   :  { %v355_v12 = vmax.f32 %v349_v8, 0.0  ;;  %v353_v13 = vpop.f32.mrb[3].mxu1  ;;  %v3867_v8 = vcombine.low %v887_v63, %v891_v0  ;;  %v3876_v9 = vcombine.high %v895_v6, %v899_v7  ;;  %v907_v11 = vld [vmem:[#allocation10 + $0x1a0] sm:$0xff] }
 0x231   :  { %v356_v14 = vmax.f32 %v351_v10, 0.0  ;;  %v903_v10 = vld [vmem:[#allocation10 + $0x180] sm:$0xff] }
 0x232   :  { %v4953_v17 = vpack.c.bf16 %v355_v12, %v355_v12  ;;  %v3875_v12 = vcombine.low %v895_v6, %v899_v7  ;;  %v3884_v13 = vcombine.high %v903_v10, %v907_v11  ;;  %v1023_v63 = vld [vmem:[#allocation10 + $0x540] sm:$0xff] }
 0x233   :  { %v358_v15 = vpack.c.bf16 %v356_v14, %v356_v14  ;;  %v911_v14 = vld [vmem:[#allocation10 + $0x1c0] sm:$0xff] }
 0x234   :  { %v1027_v0 = vld [vmem:[#allocation10 + $0x560] sm:$0xff] }
 0x235   :  { %797 = vmatprep.mubr.bf16.mxu1 %v358_v15  ;;  %v4004_v6 = vcombine.high %v1023_v63, %v1027_v0 }
 0x236   :  { %798 = vmatmul.mubr.bf16.vlgmr.msra.gmra.mrb[4].mxu1 %v4953_v17 }
 0x237   :  { %807 = vmatpush1.bf16.msra.mxu1 %v4366_v16  ;;  %838 = vmatprep.mubr.bf16.mxu1 %v358_v15  ;;  %v915_v15 = vld [vmem:[#allocation10 + $0x1e0] sm:$0xff]  ;;  %v3883_v16 = vcombine.low %v903_v10, %v907_v11 }
 0x238   :  { %808 = vmatprep.subr.bf16.mxu1 %v4371_v18  ;;  %v919_v18 = vld [vmem:[#allocation10 + $0x200] sm:$0xff] }
 0x239   :  { %v1031_v10 = vld [vmem:[#allocation10 + $0x580] sm:$0xff] }
 0x23a   :  { %v1035_v11 = vld [vmem:[#allocation10 + $0x5a0] sm:$0xff] }
 0x23b   :  { %809 = vmatpush1.bf16.msra.mxu1 %v4369_v19  ;;  %v923_v19 = vld [vmem:[#allocation10 + $0x220] sm:$0xff] }
 0x23c   :  { %810 = vmatprep.subr.bf16.mxu1 %v4374_v20  ;;  %v983_v20 = vld [vmem:[#allocation10 + $0x400] sm:$0xff] }
 0x23f   :  { %811 = vmatpush1.bf16.msra.mxu1 %v4372_v21  ;;  %v987_v21 = vld [vmem:[#allocation10 + $0x420] sm:$0xff] }
 0x240   :  { %812 = vmatprep.subr.bf16.mxu1 %v4377_v22  ;;  %v3891_v22 = vcombine.low %v911_v14, %v915_v15 }
 0x243   :  { %813 = vmatpush1.bf16.msra.mxu1 %v4375_v23  ;;  %v3963_v23 = vcombine.low %v983_v20, %v987_v21 }
 0x244   :  { %814 = vmatprep.subr.bf16.mxu1 %v4380_v24  ;;  %v3964_v24 = vcombine.high %v983_v20, %v987_v21 }
 0x246   :  { %2474 = vmatprep.subr.bf16.mxu0 %v3964_v24  ;;  %v1047_v24 = vld [vmem:[#allocation10 + $0x600] sm:$0xff] }
 0x247   :  { %815 = vmatpush1.bf16.msra.mxu1 %v4378_v25  ;;  %v4957_v25 = vld [vmem:[#allocation10 + $0x8] sm:$0xff]  ;;  %2475 = vmatpush1.bf16.msra.mxu0 %v3963_v23 }
 0x248   :  { %816 = vmatprep.subr.bf16.mxu1 %v4383_v26  ;;  %v4959_v26 = vld [vmem:[#allocation10 + $0x28] sm:$0xff] }
 0x24b   :  { %817 = vmatpush1.bf16.msra.mxu1 %v4381_v27  ;;  %v3900_v27 = vcombine.high %v919_v18, %v923_v19 }
 0x24c   :  { %818 = vmatprep.subr.bf16.mxu1 %v4386_v28  ;;  %v927_v28 = vld [vmem:[#allocation10 + $0x240] sm:$0xff] }
 0x24f   :  { %819 = vmatpush1.bf16.msra.mxu1 %v4384_v29  ;;  %v931_v29 = vld [vmem:[#allocation10 + $0x260] sm:$0xff] }
 0x250   :  { %820 = vmatprep.subr.bf16.mxu1 %v4389_v30  ;;  %v3837_v30 = vcombine.low %v4957_v25, %v4959_v26 }
 0x253   :  { %821 = vmatpush1.bf16.msra.mxu1 %v4387_v31  ;;  %v991_v31 = vld [vmem:[#allocation10 + $0x440] sm:$0xff] }
 0x254   :  { %822 = vmatprep.subr.bf16.mxu1 %v4392_v32  ;;  %v995_v32 = vld [vmem:[#allocation10 + $0x460] sm:$0xff] }
 0x257   :  { %823 = vmatpush1.bf16.msra.mxu1 %v4390_v33  ;;  %v3899_v33 = vcombine.low %v919_v18, %v923_v19  ;;  %v1039_v18 = vld [vmem:[#allocation10 + $0x5c0] sm:$0xff] }
 0x258   :  { %824 = vmatprep.subr.bf16.mxu1 %v4395_v34  ;;  %v3971_v34 = vcombine.low %v991_v31, %v995_v32  ;;  %v1043_v19 = vld [vmem:[#allocation10 + $0x5e0] sm:$0xff] }
 0x259   :  { %v4019_v21 = vcombine.low %v1039_v18, %v1043_v19 }
 0x25b   :  { %825 = vmatpush1.bf16.msra.mxu1 %v4393_v35  ;;  %v3972_v35 = vcombine.high %v991_v31, %v995_v32  ;;  %v3838_v32 = vcombine.high %v4957_v25, %v4959_v26  ;;  %v900_v25 = vld [vmem:[#allocation10 + $0x168] sm:$0xff] }
 0x25c   :  { %826 = vmatprep.subr.bf16.mxu1 %v4398_v36  ;;  %v3908_v36 = vcombine.high %v927_v28, %v931_v29 }
 0x25d   :  { %2476 = vmatprep.subr.bf16.mxu0 %v3972_v35 }
 0x25e   :  { %2477 = vmatpush1.bf16.msra.mxu0 %v3971_v34  ;;  %v1059_v34 = vld [vmem:[#allocation10 + $0x660] sm:$0xff] }
 0x25f   :  { %827 = vmatpush1.bf16.msra.mxu1 %v4396_v37  ;;  %v935_v37 = vld [vmem:[#allocation10 + $0x280] sm:$0xff] }
 0x260   :  { %828 = vmatprep.subr.bf16.mxu1 %v4401_v38  ;;  %v939_v38 = vld [vmem:[#allocation10 + $0x2a0] sm:$0xff] }
 0x263   :  { %829 = vmatpush1.bf16.msra.mxu1 %v4399_v39  ;;  %v999_v39 = vld [vmem:[#allocation10 + $0x480] sm:$0xff] }
 0x264   :  { %830 = vmatprep.subr.bf16.mxu1 %v4404_v40  ;;  %v1003_v40 = vld [vmem:[#allocation10 + $0x4a0] sm:$0xff] }
 0x267   :  { %831 = vmatpush1.bf16.msra.mxu1 %v4402_v41  ;;  %v3907_v41 = vcombine.low %v927_v28, %v931_v29 }
 0x268   :  { %832 = vmatprep.subr.bf16.mxu1 %v4407_v42  ;;  %v3979_v42 = vcombine.low %v999_v39, %v1003_v40 }
 0x26b   :  { %833 = vmatpush1.bf16.msra.mxu1 %v4405_v43  ;;  %v3980_v43 = vcombine.high %v999_v39, %v1003_v40 }
 0x26c   :  { %834 = vmatprep.subr.bf16.mxu1 %v4410_v44  ;;  %v3916_v44 = vcombine.high %v935_v37, %v939_v38 }
 0x26d   :  { %2478 = vmatprep.subr.bf16.mxu0 %v3980_v43 }
 0x26e   :  { %2479 = vmatpush1.bf16.msra.mxu0 %v3979_v42  ;;  %v1075_v42 = vld [vmem:[#allocation10 + $0x6e0] sm:$0xff] }
 0x26f   :  { %835 = vmatpush1.bf16.msra.mxu1 %v4408_v45  ;;  %v943_v45 = vld [vmem:[#allocation10 + $0x2c0] sm:$0xff]  ;;  %2480 = vmatprep.subr.bf16.mxu0 %v3988_v51 }
 0x270   :  { %836 = vmatprep.subr.bf16.mxu1 %v4413_v46  ;;  %v947_v46 = vld [vmem:[#allocation10 + $0x2e0] sm:$0xff] }
 0x271   :  { %v3924_v52 = vcombine.high %v943_v45, %v947_v46 }
 0x273   :  { %837 = vmatpush1.bf16.msra.mxu1 %v4411_v49  ;;  %v3915_v49 = vcombine.low %v935_v37, %v939_v38  ;;  %v1063_v37 = vld [vmem:[#allocation10 + $0x680] sm:$0xff] }
 0x274   :  { %2433 = vmatprep.subr.bf16.mxu1 %v3836_v50  ;;  %v3987_v50 = vcombine.low %v1007_v47, %v1011_v48  ;;  %v1067_v38 = vld [vmem:[#allocation10 + $0x6a0] sm:$0xff] }
 0x275   :  { %v4043_v39 = vcombine.low %v1063_v37, %v1067_v38  ;;  %v4044_v40 = vcombine.high %v1063_v37, %v1067_v38  ;;  %v908_v37 = vld [vmem:[#allocation10 + $0x1a8] sm:$0xff] }
 0x276   :  { %839 = vmatmul.mubr.bf16.vlgmr.msra.gmra.mrb[8].mxu1 %v4953_v17  ;;  %v3892_v17 = vcombine.high %v911_v14, %v915_v15  ;;  %2481 = vmatpush1.bf16.msra.mxu0 %v3987_v50  ;;  %v4012_v14 = vcombine.high %v1031_v10, %v1035_v11  ;;  %v1091_v50 = vld [vmem:[#allocation10 + $0x760] sm:$0xff] }
 0x277   :  { %2434 = vmatpush1.bf16.msra.mxu1 %v3835_v53  ;;  %v951_v53 = vld [vmem:[#allocation10 + $0x300] sm:$0xff]  ;;  %2482 = vmatprep.subr.bf16.mxu0 %v3996_v59 }
 0x278   :  { %2435 = vmatprep.subr.bf16.mxu1 %v3844_v54  ;;  %v955_v54 = vld [vmem:[#allocation10 + $0x320] sm:$0xff] }
 0x279   :  { %v3932_v60 = vcombine.high %v951_v53, %v955_v54 }
 0x27b   :  { %2436 = vmatpush1.bf16.msra.mxu1 %v3843_v57  ;;  %v3923_v57 = vcombine.low %v943_v45, %v947_v46  ;;  %v1079_v45 = vld [vmem:[#allocation10 + $0x700] sm:$0xff] }
 0x27c   :  { %2437 = vmatprep.subr.bf16.mxu1 %v3852_v58  ;;  %v3995_v58 = vcombine.low %v1015_v55, %v1019_v56  ;;  %v1083_v46 = vld [vmem:[#allocation10 + $0x720] sm:$0xff] }
 0x27d   :  { %v4059_v47 = vcombine.low %v1079_v45, %v1083_v46  ;;  %v4060_v48 = vcombine.high %v1079_v45, %v1083_v46  ;;  %v924_v45 = vld [vmem:[#allocation10 + $0x228] sm:$0xff] }
 0x27e   :  { %2483 = vmatpush1.bf16.msra.mxu0 %v3995_v58  ;;  %v1107_v58 = vld [vmem:[#allocation10 + $0x7e0] sm:$0xff] }
 0x27f   :  { %2438 = vmatpush1.bf16.msra.mxu1 %v3851_v61  ;;  %v959_v61 = vld [vmem:[#allocation10 + $0x340] sm:$0xff]  ;;  %2484 = vmatprep.subr.bf16.mxu0 %v4004_v6 }
 0x280   :  { %2439 = vmatprep.subr.bf16.mxu1 %v3860_v62  ;;  %v963_v62 = vld [vmem:[#allocation10 + $0x360] sm:$0xff] }
 0x281   :  { %v3940_v7 = vcombine.high %v959_v61, %v963_v62 }
 0x283   :  { %2440 = vmatpush1.bf16.msra.mxu1 %v3859_v3  ;;  %v3931_v3 = vcombine.low %v951_v53, %v955_v54  ;;  %v1095_v53 = vld [vmem:[#allocation10 + $0x780] sm:$0xff] }
 0x284   :  { %2441 = vmatprep.subr.bf16.mxu1 %v3868_v5  ;;  %v4003_v5 = vcombine.low %v1023_v63, %v1027_v0  ;;  %v1099_v54 = vld [vmem:[#allocation10 + $0x7a0] sm:$0xff] }
 0x285   :  { %v4076_v55 = vcombine.high %v1095_v53, %v1099_v54  ;;  %v4075_v56 = vcombine.low %v1095_v53, %v1099_v54  ;;  %v940_v53 = vld [vmem:[#allocation10 + $0x2a8] sm:$0xff] }
 0x286   :  { %2485 = vmatpush1.bf16.msra.mxu0 %v4003_v5 }
 0x287   :  { %2442 = vmatpush1.bf16.msra.mxu1 %v3867_v8  ;;  %v967_v8 = vld [vmem:[#allocation10 + $0x380] sm:$0xff]  ;;  %2486 = vmatprep.subr.bf16.mxu0 %v4012_v14 }
 0x288   :  { %2443 = vmatprep.subr.bf16.mxu1 %v3876_v9  ;;  %v971_v9 = vld [vmem:[#allocation10 + $0x3a0] sm:$0xff] }
 0x289   :  { %v3948_v15 = vcombine.high %v967_v8, %v971_v9  ;;  %v3947_v20 = vcombine.low %v967_v8, %v971_v9 }
 0x28b   :  { %2444 = vmatpush1.bf16.msra.mxu1 %v3875_v12  ;;  %v3939_v12 = vcombine.low %v959_v61, %v963_v62  ;;  %v4965_v61 = vld [vmem:[#allocation10 + $0x10] sm:$0xff] }
 0x28c   :  { %2445 = vmatprep.subr.bf16.mxu1 %v3884_v13  ;;  %v4011_v13 = vcombine.low %v1031_v10, %v1035_v11  ;;  %v4967_v62 = vld [vmem:[#allocation10 + $0x30] sm:$0xff] }
 0x28d   :  { %v3840_v63 = vcombine.high %v4965_v61, %v4967_v62  ;;  %v3839_v0 = vcombine.low %v4965_v61, %v4967_v62 }
 0x28e   :  { %2487 = vmatpush1.bf16.msra.mxu0 %v4011_v13 }
 0x28f   :  { %2446 = vmatpush1.bf16.msra.mxu1 %v3883_v16  ;;  %v975_v16 = vld [vmem:[#allocation10 + $0x3c0] sm:$0xff] }
 0x290   :  { %2447 = vmatprep.subr.bf16.mxu1 %v3892_v17  ;;  %v979_v17 = vld [vmem:[#allocation10 + $0x3e0] sm:$0xff] }
 0x291   :  { %v3956_v23 = vcombine.high %v975_v16, %v979_v17  ;;  %v3955_v28 = vcombine.low %v975_v16, %v979_v17  ;;  %v868_v16 = vld [vmem:[#allocation10 + $0x68] sm:$0xff] }
 0x293   :  { %2448 = vmatpush1.bf16.msra.mxu1 %v3891_v22  ;;  %v4020_v22 = vcombine.high %v1039_v18, %v1043_v19 }
 0x294   :  { %2449 = vmatprep.subr.bf16.mxu1 %v3900_v27  ;;  %v1051_v27 = vld [vmem:[#allocation10 + $0x620] sm:$0xff] }
 0x295   :  { %2488 = vmatprep.subr.bf16.mxu0 %v4020_v22  ;;  %v4027_v29 = vcombine.low %v1047_v24, %v1051_v27  ;;  %v4028_v31 = vcombine.high %v1047_v24, %v1051_v27  ;;  %v880_v24 = vld [vmem:[#allocation10 + $0xc8] sm:$0xff] }
 0x296   :  { %2489 = vmatpush1.bf16.msra.mxu0 %v4019_v21  ;;  %v876_v21 = vld [vmem:[#allocation10 + $0xa8] sm:$0xff] }
 0x297   :  { %2450 = vmatpush1.bf16.msra.mxu1 %v3899_v33  ;;  %2490 = vmatprep.subr.bf16.mxu0 %v4028_v31  ;;  %v1055_v33 = vld [vmem:[#allocation10 + $0x640] sm:$0xff]  ;;  %v884_v27 = vld [vmem:[#allocation10 + $0xe8] sm:$0xff] }
 0x298   :  { %2451 = vmatprep.subr.bf16.mxu1 %v3908_v36  ;;  %v4035_v35 = vcombine.low %v1055_v33, %v1059_v34  ;;  %v4036_v36 = vcombine.high %v1055_v33, %v1059_v34  ;;  %v888_v31 = vld [vmem:[#allocation10 + $0x108] sm:$0xff]  ;;  %v3861_v33 = vcombine.low %v880_v24, %v884_v27 }
 0x29a   :  { %2491 = vmatpush1.bf16.msra.mxu0 %v4027_v29  ;;  %v3862_v29 = vcombine.high %v880_v24, %v884_v27 }
 0x29b   :  { %2452 = vmatpush1.bf16.msra.mxu1 %v3907_v41  ;;  %2492 = vmatprep.subr.bf16.mxu0 %v4036_v36  ;;  %v1071_v41 = vld [vmem:[#allocation10 + $0x6c0] sm:$0xff]  ;;  %v904_v36 = vld [vmem:[#allocation10 + $0x188] sm:$0xff] }
 0x29c   :  { %2453 = vmatprep.subr.bf16.mxu1 %v3916_v44  ;;  %v4051_v43 = vcombine.low %v1071_v41, %v1075_v42  ;;  %v4052_v44 = vcombine.high %v1071_v41, %v1075_v42  ;;  %v916_v41 = vld [vmem:[#allocation10 + $0x1e8] sm:$0xff]  ;;  %v3885_v42 = vcombine.low %v904_v36, %v908_v37 }
 0x29e   :  { %2493 = vmatpush1.bf16.msra.mxu0 %v4035_v35  ;;  %v896_v35 = vld [vmem:[#allocation10 + $0x148] sm:$0xff] }
 0x29f   :  { %2454 = vmatpush1.bf16.msra.mxu1 %v3915_v49  ;;  %2494 = vmatprep.subr.bf16.mxu0 %v4044_v40  ;;  %v1087_v49 = vld [vmem:[#allocation10 + $0x740] sm:$0xff]  ;;  %v3877_v38 = vcombine.low %v896_v35, %v900_v25  ;;  %v912_v40 = vld [vmem:[#allocation10 + $0x1c8] sm:$0xff] }
 0x2a0   :  { %2455 = vmatprep.subr.bf16.mxu1 %v3924_v52  ;;  %v4067_v51 = vcombine.low %v1087_v49, %v1091_v50  ;;  %v4068_v52 = vcombine.high %v1087_v49, %v1091_v50  ;;  %v3893_v46 = vcombine.low %v912_v40, %v916_v41  ;;  %v932_v49 = vld [vmem:[#allocation10 + $0x268] sm:$0xff] }
 0x2a2   :  { %2495 = vmatpush1.bf16.msra.mxu0 %v4043_v39  ;;  %v3886_v39 = vcombine.high %v904_v36, %v908_v37  ;;  %v865_v37 = vld [vmem:[#allocation10 + $0x50] sm:$0xff] }
 0x2a3   :  { %2456 = vmatpush1.bf16.msra.mxu1 %v3923_v57  ;;  %2496 = vmatprep.subr.bf16.mxu0 %v4052_v44  ;;  %v1103_v57 = vld [vmem:[#allocation10 + $0x7c0] sm:$0xff]  ;;  %v920_v44 = vld [vmem:[#allocation10 + $0x208] sm:$0xff] }
 0x2a4   :  { %2457 = vmatprep.subr.bf16.mxu1 %v3932_v60  ;;  %v4084_v59 = vcombine.high %v1103_v57, %v1107_v58  ;;  %v4083_v60 = vcombine.low %v1103_v57, %v1107_v58  ;;  %v3901_v50 = vcombine.low %v920_v44, %v924_v45  ;;  %v948_v57 = vld [vmem:[#allocation10 + $0x2e8] sm:$0xff] }
 0x2a6   :  { %2497 = vmatpush1.bf16.msra.mxu0 %v4051_v43  ;;  %v3894_v43 = vcombine.high %v912_v40, %v916_v41 }
 0x2a7   :  { %2458 = vmatpush1.bf16.msra.mxu1 %v3931_v3  ;;  %2498 = vmatprep.subr.bf16.mxu0 %v4060_v48  ;;  %v4976_v3 = vld [vmem:[%s5072_s6] sm:$0xf]  ;;  %v928_v48 = vld [vmem:[#allocation10 + $0x248] sm:$0xff] }
 0x2a8   :  { %2459 = vmatprep.subr.bf16.mxu1 %v3940_v7  ;;  %v428_v5 = vrot.slane %v4976_v3, %v4943_v2  ;;  %v432_v6 = vrot.slane %v4976_v3, %v4949_v4  ;;  %v3909_v54 = vcombine.low %v928_v48, %v932_v49 }
 0x2aa   :  { %2499 = vmatpush1.bf16.msra.mxu0 %v4059_v47  ;;  %v3902_v47 = vcombine.high %v920_v44, %v924_v45 }
 0x2ab   :  { %2460 = vmatpush1.bf16.msra.mxu1 %v3939_v12  ;;  %2500 = vmatprep.subr.bf16.mxu0 %v4068_v52  ;;  %v936_v52 = vld [vmem:[#allocation10 + $0x288] sm:$0xff] }
 0x2ac   :  { %2461 = vmatprep.subr.bf16.mxu1 %v3948_v15  ;;  %v864_v15 = vld [vmem:[#allocation10 + $0x48] sm:$0xff]  ;;  %v3917_v58 = vcombine.low %v936_v52, %v940_v53 }
 0x2ad   :  { %v3846_v19 = vcombine.high %v864_v15, %v868_v16  ;;  %v3845_v22 = vcombine.low %v864_v15, %v868_v16  ;;  %v439_v15 = vsub.s32 3, %v4940_v1 }
 0x2ae   :  { %2501 = vmatpush1.bf16.msra.mxu0 %v4067_v51  ;;  %v3910_v51 = vcombine.high %v928_v48, %v932_v49  ;;  %v1004_v48 = vld [vmem:[#allocation10 + $0x4a8] sm:$0xff] }
 0x2af   :  { %2462 = vmatpush1.bf16.msra.mxu1 %v3947_v20  ;;  %2502 = vmatprep.subr.bf16.mxu0 %v4076_v55  ;;  %v872_v20 = vld [vmem:[#allocation10 + $0x88] sm:$0xff]  ;;  %v3918_v55 = vcombine.high %v936_v52, %v940_v53  ;;  %v881_v53 = vld [vmem:[#allocation10 + $0xd0] sm:$0xff] }
 0x2b0   :  { %2463 = vmatprep.subr.bf16.mxu1 %v3956_v23  ;;  %v3854_v23 = vcombine.high %v872_v20, %v876_v21 }
 0x2b2   :  { %2503 = vmatpush1.bf16.msra.mxu0 %v4075_v56  ;;  %v944_v56 = vld [vmem:[#allocation10 + $0x2c8] sm:$0xff] }
 0x2b3   :  { %2464 = vmatpush1.bf16.msra.mxu1 %v3955_v28  ;;  %2504 = vmatprep.subr.bf16.mxu0 %v4084_v59  ;;  %v3853_v28 = vcombine.low %v872_v20, %v876_v21  ;;  %v3926_v59 = vcombine.high %v944_v56, %v948_v57  ;;  %v980_v20 = vld [vmem:[#allocation10 + $0x3e8] sm:$0xff] }
 0x2b4   :  { %2515 = vmatprep.subr.bf16.mxu1 %v3838_v32  ;;  %v892_v32 = vld [vmem:[#allocation10 + $0x128] sm:$0xff] }
 0x2b5   :  { %v3870_v34 = vcombine.high %v888_v31, %v892_v32  ;;  %v3869_v26 = vcombine.low %v888_v31, %v892_v32 }
 0x2b6   :  { %2505 = vmatpush1.bf16.msra.mxu0 %v4083_v60  ;;  %v952_v60 = vld [vmem:[#allocation10 + $0x308] sm:$0xff] }
 0x2b7   :  { %2597 = vmatprep.subr.bf16.mxu0 %v3840_v63  ;;  %v956_v63 = vld [vmem:[#allocation10 + $0x328] sm:$0xff] }
 0x309   :  { %v799_v7 = vpop.f32.mrb[4].mxu1 }
 0x30a   :  { %v800_v8 = vadd.f32 %v799_v7, %v428_v5  ;;  %v801_v9 = vpop.f32.mrb[5].mxu1  ;;  %v3925_v5 = vcombine.low %v944_v56, %v948_v57  ;;  %v960_v7 = vld [vmem:[#allocation10 + $0x348] sm:$0xff] }
 0x30b   :  { %v802_v10 = vadd.f32 %v801_v9, %v432_v6  ;;  %v803_v11 = vpop.f32.mrb[6].mxu1  ;;  %v3934_v6 = vcombine.high %v952_v60, %v956_v63  ;;  %v3933_v9 = vcombine.low %v952_v60, %v956_v63  ;;  %v1012_v56 = vld [vmem:[#allocation10 + $0x4e8] sm:$0xff] }
 0x30c   :  { %v847_v12 = vmax.f32 %v800_v8, 0.0  ;;  %v804_v13 = vpop.f32.mrb[7].mxu1  ;;  %v964_v8 = vld [vmem:[#allocation10 + $0x368] sm:$0xff] }
 0x30d   :  { %v848_v14 = vmax.f32 %v802_v10, 0.0  ;;  %v3942_v10 = vcombine.high %v960_v7, %v964_v8  ;;  %v968_v11 = vld [vmem:[#allocation10 + $0x388] sm:$0xff]  ;;  %v435_v13 = vsub.s32 2, %v4940_v1 }
 0x30e   :  { %v4984_v18 = vpack.c.bf16 %v847_v12, %v847_v12  ;;  %v972_v12 = vld [vmem:[#allocation10 + $0x3a8] sm:$0xff] }
 0x30f   :  { %v4982_v17 = vpack.c.bf16 %v848_v14, %v848_v14  ;;  %v3941_v14 = vcombine.low %v960_v7, %v964_v8  ;;  %v3950_v16 = vcombine.high %v968_v11, %v972_v12  ;;  %v436_v21 = vrot.slane %v4976_v3, %v435_v13  ;;  %v1016_v60 = vld [vmem:[#allocation10 + $0x508] sm:$0xff] }
 0x310   :  { %v1020_v63 = vld [vmem:[#allocation10 + $0x528] sm:$0xff] }
 0x311   :  { %2465 = vmatprep.mubr.bf16.mxu1 %v4982_v17  ;;  %v3998_v8 = vcombine.high %v1016_v60, %v1020_v63 }
 0x312   :  { %2466 = vmatmul.mubr.bf16.vlgmr.msra.gmra.mrb[12].mxu1 %v4984_v18 }
 0x313   :  { %2516 = vmatpush1.bf16.msra.mxu1 %v3837_v30  ;;  %2547 = vmatprep.mubr.bf16.mxu1 %v4982_v17  ;;  %v3878_v30 = vcombine.high %v896_v35, %v900_v25 }
 0x314   :  { %2517 = vmatprep.subr.bf16.mxu1 %v3846_v19  ;;  %v976_v19 = vld [vmem:[#allocation10 + $0x3c8] sm:$0xff] }
 0x315   :  { %v3958_v24 = vcombine.high %v976_v19, %v980_v20  ;;  %v3957_v35 = vcombine.low %v976_v19, %v980_v20 }
 0x317   :  { %2518 = vmatpush1.bf16.msra.mxu1 %v3845_v22  ;;  %v440_v22 = vrot.slane %v4976_v3, %v439_v15  ;;  %v992_v3 = vld [vmem:[#allocation10 + $0x448] sm:$0xff] }
 0x318   :  { %2519 = vmatprep.subr.bf16.mxu1 %v3854_v23  ;;  %v3949_v23 = vcombine.low %v968_v11, %v972_v12  ;;  %v1024_v11 = vld [vmem:[#allocation10 + $0x548] sm:$0xff] }
 0x319   :  { %v1028_v12 = vld [vmem:[#allocation10 + $0x568] sm:$0xff] }
 0x31a   :  { %v4006_v20 = vcombine.high %v1024_v11, %v1028_v12 }
 0x31b   :  { %2520 = vmatpush1.bf16.msra.mxu1 %v3853_v28  ;;  %v984_v28 = vld [vmem:[#allocation10 + $0x408] sm:$0xff] }
 0x31c   :  { %2521 = vmatprep.subr.bf16.mxu1 %v3862_v29  ;;  %v988_v29 = vld [vmem:[#allocation10 + $0x428] sm:$0xff] }
 0x31d   :  { %v3965_v41 = vcombine.low %v984_v28, %v988_v29 }
 0x31f   :  { %2522 = vmatpush1.bf16.msra.mxu1 %v3861_v33 }
 0x320   :  { %2523 = vmatprep.subr.bf16.mxu1 %v3870_v34 }
 0x323   :  { %2524 = vmatpush1.bf16.msra.mxu1 %v3869_v26 }
 0x324   :  { %2525 = vmatprep.subr.bf16.mxu1 %v3878_v30  ;;  %v3966_v30 = vcombine.high %v984_v28, %v988_v29  ;;  %v4005_v28 = vcombine.low %v1024_v11, %v1028_v12  ;;  %v957_v11 = vld [vmem:[#allocation10 + $0x330] sm:$0xff]  ;;  %v1080_v12 = vld [vmem:[#allocation10 + $0x708] sm:$0xff] }
 0x327   :  { %2526 = vmatpush1.bf16.msra.mxu1 %v3877_v38  ;;  %v869_v38 = vld [vmem:[#allocation10 + $0x70] sm:$0xff] }
 0x328   :  { %2527 = vmatprep.subr.bf16.mxu1 %v3886_v39  ;;  %v996_v39 = vld [vmem:[#allocation10 + $0x468] sm:$0xff]  ;;  %v3848_v44 = vcombine.high %v865_v37, %v869_v38  ;;  %v3847_v49 = vcombine.low %v865_v37, %v869_v38  ;;  %v921_v37 = vld [vmem:[#allocation10 + $0x210] sm:$0xff] }
 0x329   :  { %v3974_v45 = vcombine.high %v992_v3, %v996_v39  ;;  %v925_v38 = vld [vmem:[#allocation10 + $0x230] sm:$0xff] }
 0x32b   :  { %2528 = vmatpush1.bf16.msra.mxu1 %v3885_v42 }
 0x32c   :  { %2529 = vmatprep.subr.bf16.mxu1 %v3894_v43  ;;  %v873_v43 = vld [vmem:[#allocation10 + $0x90] sm:$0xff] }
 0x32f   :  { %2530 = vmatpush1.bf16.msra.mxu1 %v3893_v46  ;;  %v877_v46 = vld [vmem:[#allocation10 + $0xb0] sm:$0xff] }
 0x330   :  { %2531 = vmatprep.subr.bf16.mxu1 %v3902_v47  ;;  %v1000_v47 = vld [vmem:[#allocation10 + $0x488] sm:$0xff]  ;;  %v3855_v57 = vcombine.low %v873_v43, %v877_v46 }
 0x331   :  { %v3982_v52 = vcombine.high %v1000_v47, %v1004_v48  ;;  %v3981_v61 = vcombine.low %v1000_v47, %v1004_v48  ;;  %v933_v47 = vld [vmem:[#allocation10 + $0x270] sm:$0xff]  ;;  %v1056_v48 = vld [vmem:[#allocation10 + $0x648] sm:$0xff] }
 0x333   :  { %2532 = vmatpush1.bf16.msra.mxu1 %v3901_v50  ;;  %v3973_v50 = vcombine.low %v992_v3, %v996_v39  ;;  %v1048_v3 = vld [vmem:[#allocation10 + $0x608] sm:$0xff] }
 0x334   :  { %2533 = vmatprep.subr.bf16.mxu1 %v3910_v51  ;;  %v3856_v51 = vcombine.high %v873_v43, %v877_v46  ;;  %v1052_v39 = vld [vmem:[#allocation10 + $0x628] sm:$0xff]  ;;  %v929_v46 = vld [vmem:[#allocation10 + $0x250] sm:$0xff] }
 0x337   :  { %2534 = vmatpush1.bf16.msra.mxu1 %v3909_v54  ;;  %v885_v54 = vld [vmem:[#allocation10 + $0xf0] sm:$0xff] }
 0x338   :  { %2535 = vmatprep.subr.bf16.mxu1 %v3918_v55  ;;  %v1008_v55 = vld [vmem:[#allocation10 + $0x4c8] sm:$0xff]  ;;  %v3864_v62 = vcombine.high %v881_v53, %v885_v54 }
 0x33b   :  { %2536 = vmatpush1.bf16.msra.mxu1 %v3917_v58  ;;  %v889_v58 = vld [vmem:[#allocation10 + $0x110] sm:$0xff] }
 0x33c   :  { %2537 = vmatprep.subr.bf16.mxu1 %v3926_v59  ;;  %v893_v59 = vld [vmem:[#allocation10 + $0x130] sm:$0xff] }
 0x33d   :  { %v3872_v7 = vcombine.high %v889_v58, %v893_v59 }
 0x33f   :  { %2538 = vmatpush1.bf16.msra.mxu1 %v3925_v5  ;;  %v3863_v5 = vcombine.low %v881_v53, %v885_v54  ;;  %v937_v54 = vld [vmem:[#allocation10 + $0x290] sm:$0xff] }
 0x340   :  { %2539 = vmatprep.subr.bf16.mxu1 %v3934_v6  ;;  %v3989_v6 = vcombine.low %v1008_v55, %v1012_v56 }
 0x343   :  { %2540 = vmatpush1.bf16.msra.mxu1 %v3933_v9  ;;  %v897_v9 = vld [vmem:[#allocation10 + $0x150] sm:$0xff] }
 0x344   :  { %2541 = vmatprep.subr.bf16.mxu1 %v3942_v10  ;;  %v901_v10 = vld [vmem:[#allocation10 + $0x170] sm:$0xff] }
 0x345   :  { %v3880_v19 = vcombine.high %v897_v9, %v901_v10 }
 0x347   :  { %2542 = vmatpush1.bf16.msra.mxu1 %v3941_v14  ;;  %v3871_v14 = vcombine.low %v889_v58, %v893_v59  ;;  %v945_v59 = vld [vmem:[#allocation10 + $0x2d0] sm:$0xff] }
 0x348   :  { %2543 = vmatprep.subr.bf16.mxu1 %v3950_v16  ;;  %v3997_v16 = vcombine.low %v1016_v60, %v1020_v63  ;;  %v949_v60 = vld [vmem:[#allocation10 + $0x2f0] sm:$0xff]  ;;  %v1072_v63 = vld [vmem:[#allocation10 + $0x6c8] sm:$0xff] }
 0x349   :  { %v840_v27 = vpop.f32.mrb[8].mxu1 }
 0x34a   :  { %v841_v31 = vadd.f32 %v840_v27, %v436_v21  ;;  %v842_v32 = vpop.f32.mrb[9].mxu1  ;;  %v905_v21 = vld [vmem:[#allocation10 + $0x190] sm:$0xff]  ;;  %v3879_v27 = vcombine.low %v897_v9, %v901_v10 }
 0x34b   :  { %v843_v33 = vadd.f32 %v842_v32, %v440_v22  ;;  %v844_v34 = vpop.f32.mrb[10].mxu1  ;;  %2544 = vmatpush1.bf16.msra.mxu1 %v3949_v23  ;;  %v909_v22 = vld [vmem:[#allocation10 + $0x1b0] sm:$0xff]  ;;  %v1032_v23 = vld [vmem:[#allocation10 + $0x588] sm:$0xff] }
 0x34c   :  { %v849_v25 = vmax.f32 %v841_v31, 0.0  ;;  %v845_v26 = vpop.f32.mrb[11].mxu1  ;;  %2545 = vmatprep.subr.bf16.mxu1 %v3958_v24  ;;  %v1036_v24 = vld [vmem:[#allocation10 + $0x5a8] sm:$0xff]  ;;  %v3888_v29 = vcombine.high %v905_v21, %v909_v22  ;;  %v913_v32 = vld [vmem:[#allocation10 + $0x1d0] sm:$0xff] }
 0x34d   :  { %v850_v36 = vmax.f32 %v843_v33, 0.0  ;;  %v4014_v31 = vcombine.high %v1032_v23, %v1036_v24  ;;  %v917_v33 = vld [vmem:[#allocation10 + $0x1f0] sm:$0xff]  ;;  %v1040_v34 = vld [vmem:[#allocation10 + $0x5c8] sm:$0xff]  ;;  %v4013_v26 = vcombine.low %v1032_v23, %v1036_v24 }
 0x34e   :  { %v5002_v42 = vpack.c.bf16 %v849_v25, %v849_v25  ;;  %v3887_v25 = vcombine.low %v905_v21, %v909_v22  ;;  %v953_v10 = vld [vmem:[#allocation10 + $0x310] sm:$0xff]  ;;  %v1088_v24 = vld [vmem:[#allocation10 + $0x748] sm:$0xff] }
 0x34f   :  { %v5000_v40 = vpack.c.bf16 %v850_v36, %v850_v36  ;;  %2546 = vmatpush1.bf16.msra.mxu1 %v3957_v35  ;;  %v1044_v35 = vld [vmem:[#allocation10 + $0x5e8] sm:$0xff]  ;;  %v961_v22 = vld [vmem:[#allocation10 + $0x350] sm:$0xff] }
 0x350   :  { %2556 = vmatprep.subr.bf16.mxu1 %v3966_v30  ;;  %v3896_v30 = vcombine.high %v913_v32, %v917_v33  ;;  %v4022_v36 = vcombine.high %v1040_v34, %v1044_v35  ;;  %v4021_v43 = vcombine.low %v1040_v34, %v1044_v35  ;;  %v965_v23 = vld [vmem:[#allocation10 + $0x370] sm:$0xff]  ;;  %v1096_v35 = vld [vmem:[#allocation10 + $0x788] sm:$0xff] }
 0x351   :  { %2506 = vmatprep.mubr.bf16.mxu0 %v5000_v40  ;;  %v973_v34 = vld [vmem:[#allocation10 + $0x3b0] sm:$0xff] }
 0x352   :  { %2507 = vmatmul.mubr.bf16.vlgmr.msra.gmra.mrb[4].mxu0 %v5002_v42  ;;  %2548 = vmatmul.mubr.bf16.vlgmr.msra.gmra.mrb[16].mxu1 %v4984_v18 }
 0x353   :  { %2598 = vmatpush1.bf16.msra.mxu0 %v3839_v0  ;;  %2557 = vmatpush1.bf16.msra.mxu1 %v3965_v41  ;;  %v3990_v0 = vcombine.high %v1008_v55, %v1012_v56  ;;  %v3895_v41 = vcombine.low %v913_v32, %v917_v33  ;;  %v941_v55 = vld [vmem:[#allocation10 + $0x2b0] sm:$0xff]  ;;  %v1064_v56 = vld [vmem:[#allocation10 + $0x688] sm:$0xff] }
 0x354   :  { %2588 = vmatprep.mubr.bf16.mxu1 %v5000_v40  ;;  %2629 = vmatprep.mubr.bf16.mxu0 %v4982_v17  ;;  %v969_v33 = vld [vmem:[#allocation10 + $0x390] sm:$0xff] }
 0x355   :  { %2599 = vmatprep.subr.bf16.mxu0 %v3848_v44  ;;  %2558 = vmatprep.subr.bf16.mxu1 %v3974_v45  ;;  %v3904_v44 = vcombine.high %v921_v37, %v925_v38  ;;  %v4030_v45 = vcombine.high %v1048_v3, %v1052_v39 }
 0x357   :  { %2600 = vmatpush1.bf16.msra.mxu0 %v3847_v49  ;;  %2559 = vmatpush1.bf16.msra.mxu1 %v3973_v50  ;;  %v1060_v49 = vld [vmem:[#allocation10 + $0x668] sm:$0xff]  ;;  %v3903_v50 = vcombine.low %v921_v37, %v925_v38  ;;  %v977_v38 = vld [vmem:[#allocation10 + $0x3d0] sm:$0xff] }
 0x358   :  { %2601 = vmatprep.subr.bf16.mxu0 %v3856_v51  ;;  %2560 = vmatprep.subr.bf16.mxu1 %v3982_v52  ;;  %v4029_v51 = vcombine.low %v1048_v3, %v1052_v39  ;;  %v3912_v52 = vcombine.high %v929_v46, %v933_v47  ;;  %v4038_v53 = vcombine.high %v1056_v48, %v1060_v49  ;;  %v981_v3 = vld [vmem:[#allocation10 + $0x3f0] sm:$0xff]  ;;  %v1104_v39 = vld [vmem:[#allocation10 + $0x7c8] sm:$0xff] }
 0x35b   :  { %2602 = vmatpush1.bf16.msra.mxu0 %v3855_v57  ;;  %2561 = vmatpush1.bf16.msra.mxu1 %v3981_v61  ;;  %v1068_v57 = vld [vmem:[#allocation10 + $0x6a8] sm:$0xff]  ;;  %v3911_v61 = vcombine.low %v929_v46, %v933_v47  ;;  %v985_v47 = vld [vmem:[#allocation10 + $0x410] sm:$0xff] }
 0x35c   :  { %2603 = vmatprep.subr.bf16.mxu0 %v3864_v62  ;;  %2562 = vmatprep.subr.bf16.mxu1 %v3990_v0  ;;  %v4037_v62 = vcombine.low %v1056_v48, %v1060_v49  ;;  %v3920_v0 = vcombine.high %v937_v54, %v941_v55  ;;  %v4046_v58 = vcombine.high %v1064_v56, %v1068_v57  ;;  %v989_v48 = vld [vmem:[#allocation10 + $0x430] sm:$0xff]  ;;  %v858_v49 = vld [vmem:[#allocation10 + $0x18] sm:$0xff] }
 0x35f   :  { %2604 = vmatpush1.bf16.msra.mxu0 %v3863_v5  ;;  %2563 = vmatpush1.bf16.msra.mxu1 %v3989_v6  ;;  %v1076_v5 = vld [vmem:[#allocation10 + $0x6e8] sm:$0xff]  ;;  %v3919_v6 = vcombine.low %v937_v54, %v941_v55  ;;  %v993_v55 = vld [vmem:[#allocation10 + $0x450] sm:$0xff] }
 0x360   :  { %2605 = vmatprep.subr.bf16.mxu0 %v3872_v7  ;;  %2564 = vmatprep.subr.bf16.mxu1 %v3998_v8  ;;  %v4045_v7 = vcombine.low %v1064_v56, %v1068_v57  ;;  %v3928_v8 = vcombine.high %v945_v59, %v949_v60  ;;  %v4054_v9 = vcombine.high %v1072_v63, %v1076_v5  ;;  %v997_v56 = vld [vmem:[#allocation10 + $0x470] sm:$0xff]  ;;  %v866_v57 = vld [vmem:[#allocation10 + $0x58] sm:$0xff] }
 0x363   :  { %2606 = vmatpush1.bf16.msra.mxu0 %v3871_v14  ;;  %2565 = vmatpush1.bf16.msra.mxu1 %v3997_v16  ;;  %v1084_v14 = vld [vmem:[#allocation10 + $0x728] sm:$0xff]  ;;  %v3927_v16 = vcombine.low %v945_v59, %v949_v60  ;;  %v1001_v60 = vld [vmem:[#allocation10 + $0x490] sm:$0xff] }
 0x364   :  { %2607 = vmatprep.subr.bf16.mxu0 %v3880_v19  ;;  %2566 = vmatprep.subr.bf16.mxu1 %v4006_v20  ;;  %v4053_v19 = vcombine.low %v1072_v63, %v1076_v5  ;;  %v3936_v20 = vcombine.high %v953_v10, %v957_v11  ;;  %v4062_v21 = vcombine.high %v1080_v12, %v1084_v14  ;;  %v1005_v63 = vld [vmem:[#allocation10 + $0x4b0] sm:$0xff]  ;;  %v874_v5 = vld [vmem:[#allocation10 + $0x98] sm:$0xff] }
 0x367   :  { %2608 = vmatpush1.bf16.msra.mxu0 %v3879_v27  ;;  %2567 = vmatpush1.bf16.msra.mxu1 %v4005_v28  ;;  %v1092_v27 = vld [vmem:[#allocation10 + $0x768] sm:$0xff]  ;;  %v3935_v28 = vcombine.low %v953_v10, %v957_v11  ;;  %v1009_v11 = vld [vmem:[#allocation10 + $0x4d0] sm:$0xff] }
 0x368   :  { %2609 = vmatprep.subr.bf16.mxu0 %v3888_v29  ;;  %2568 = vmatprep.subr.bf16.mxu1 %v4014_v31  ;;  %v4061_v29 = vcombine.low %v1080_v12, %v1084_v14  ;;  %v3944_v31 = vcombine.high %v961_v22, %v965_v23  ;;  %v4070_v32 = vcombine.high %v1088_v24, %v1092_v27  ;;  %v1013_v12 = vld [vmem:[#allocation10 + $0x4f0] sm:$0xff]  ;;  %v882_v14 = vld [vmem:[#allocation10 + $0xd8] sm:$0xff] }
 0x36b   :  { %2610 = vmatpush1.bf16.msra.mxu0 %v3887_v25  ;;  %2569 = vmatpush1.bf16.msra.mxu1 %v4013_v26  ;;  %v1100_v25 = vld [vmem:[#allocation10 + $0x7a8] sm:$0xff]  ;;  %v3943_v26 = vcombine.low %v961_v22, %v965_v23  ;;  %v1017_v23 = vld [vmem:[#allocation10 + $0x510] sm:$0xff] }
 0x36c   :  { %2611 = vmatprep.subr.bf16.mxu0 %v3896_v30  ;;  %2570 = vmatprep.subr.bf16.mxu1 %v4022_v36  ;;  %v4069_v30 = vcombine.low %v1088_v24, %v1092_v27  ;;  %v3952_v36 = vcombine.high %v969_v33, %v973_v34  ;;  %v4078_v37 = vcombine.high %v1096_v35, %v1100_v25  ;;  %v1021_v24 = vld [vmem:[#allocation10 + $0x530] sm:$0xff]  ;;  %v894_v27 = vld [vmem:[#allocation10 + $0x138] sm:$0xff] }
 0x36f   :  { %2612 = vmatpush1.bf16.msra.mxu0 %v3895_v41  ;;  %2571 = vmatpush1.bf16.msra.mxu1 %v4021_v43  ;;  %v1108_v41 = vld [vmem:[#allocation10 + $0x7e8] sm:$0xff]  ;;  %v3951_v43 = vcombine.low %v969_v33, %v973_v34  ;;  %v1025_v33 = vld [vmem:[#allocation10 + $0x550] sm:$0xff] }
 0x370   :  { %2613 = vmatprep.subr.bf16.mxu0 %v3904_v44  ;;  %2572 = vmatprep.subr.bf16.mxu1 %v4030_v45  ;;  %v4077_v44 = vcombine.low %v1096_v35, %v1100_v25  ;;  %v3960_v45 = vcombine.high %v977_v38, %v981_v3  ;;  %v4086_v46 = vcombine.high %v1104_v39, %v1108_v41  ;;  %v1029_v34 = vld [vmem:[#allocation10 + $0x570] sm:$0xff]  ;;  %v898_v35 = vld [vmem:[#allocation10 + $0x158] sm:$0xff] }
 0x371   :  { %v902_v25 = vld [vmem:[#allocation10 + $0x178] sm:$0xff] }
 0x373   :  { %2614 = vmatpush1.bf16.msra.mxu0 %v3903_v50  ;;  %2573 = vmatpush1.bf16.msra.mxu1 %v4029_v51  ;;  %v862_v50 = vld [vmem:[#allocation10 + $0x38] sm:$0xff]  ;;  %v3959_v51 = vcombine.low %v977_v38, %v981_v3  ;;  %v1033_v38 = vld [vmem:[#allocation10 + $0x590] sm:$0xff] }
 0x374   :  { %2615 = vmatprep.subr.bf16.mxu0 %v3912_v52  ;;  %2574 = vmatprep.subr.bf16.mxu1 %v4038_v53  ;;  %v4085_v52 = vcombine.low %v1104_v39, %v1108_v41  ;;  %v3968_v53 = vcombine.high %v985_v47, %v989_v48  ;;  %v3842_v54 = vcombine.high %v858_v49, %v862_v50  ;;  %v1037_v3 = vld [vmem:[#allocation10 + $0x5b0] sm:$0xff]  ;;  %v906_v39 = vld [vmem:[#allocation10 + $0x198] sm:$0xff] }
 0x375   :  { %v910_v41 = vld [vmem:[#allocation10 + $0x1b8] sm:$0xff] }
 0x377   :  { %2616 = vmatpush1.bf16.msra.mxu0 %v3911_v61  ;;  %2575 = vmatpush1.bf16.msra.mxu1 %v4037_v62  ;;  %v870_v61 = vld [vmem:[#allocation10 + $0x78] sm:$0xff]  ;;  %v3967_v62 = vcombine.low %v985_v47, %v989_v48  ;;  %v1041_v47 = vld [vmem:[#allocation10 + $0x5d0] sm:$0xff] }
 0x378   :  { %2617 = vmatprep.subr.bf16.mxu0 %v3920_v0  ;;  %2576 = vmatprep.subr.bf16.mxu1 %v4046_v58  ;;  %v3841_v0 = vcombine.low %v858_v49, %v862_v50  ;;  %v3976_v58 = vcombine.high %v993_v55, %v997_v56  ;;  %v3850_v59 = vcombine.high %v866_v57, %v870_v61  ;;  %v1045_v48 = vld [vmem:[#allocation10 + $0x5f0] sm:$0xff]  ;;  %v914_v49 = vld [vmem:[#allocation10 + $0x1d8] sm:$0xff] }
 0x379   :  { %v918_v50 = vld [vmem:[#allocation10 + $0x1f8] sm:$0xff] }
 0x37b   :  { %2618 = vmatpush1.bf16.msra.mxu0 %v3919_v6  ;;  %2577 = vmatpush1.bf16.msra.mxu1 %v4045_v7  ;;  %v878_v6 = vld [vmem:[#allocation10 + $0xb8] sm:$0xff]  ;;  %v3975_v7 = vcombine.low %v993_v55, %v997_v56  ;;  %v1049_v55 = vld [vmem:[#allocation10 + $0x610] sm:$0xff] }
 0x37c   :  { %2619 = vmatprep.subr.bf16.mxu0 %v3928_v8  ;;  %2578 = vmatprep.subr.bf16.mxu1 %v4054_v9  ;;  %v3849_v8 = vcombine.low %v866_v57, %v870_v61  ;;  %v3984_v9 = vcombine.high %v1001_v60, %v1005_v63  ;;  %v3858_v10 = vcombine.high %v874_v5, %v878_v6  ;;  %v1053_v56 = vld [vmem:[#allocation10 + $0x630] sm:$0xff]  ;;  %v922_v57 = vld [vmem:[#allocation10 + $0x218] sm:$0xff] }
 0x37d   :  { %v926_v61 = vld [vmem:[#allocation10 + $0x238] sm:$0xff] }
 0x37f   :  { %2620 = vmatpush1.bf16.msra.mxu0 %v3927_v16  ;;  %2579 = vmatpush1.bf16.msra.mxu1 %v4053_v19  ;;  %v886_v16 = vld [vmem:[#allocation10 + $0xf8] sm:$0xff]  ;;  %v3983_v19 = vcombine.low %v1001_v60, %v1005_v63  ;;  %v1057_v60 = vld [vmem:[#allocation10 + $0x650] sm:$0xff] }
 0x380   :  { %2621 = vmatprep.subr.bf16.mxu0 %v3936_v20  ;;  %2580 = vmatprep.subr.bf16.mxu1 %v4062_v21  ;;  %v3857_v20 = vcombine.low %v874_v5, %v878_v6  ;;  %v3992_v21 = vcombine.high %v1009_v11, %v1013_v12  ;;  %v3866_v22 = vcombine.high %v882_v14, %v886_v16  ;;  %v1061_v63 = vld [vmem:[#allocation10 + $0x670] sm:$0xff]  ;;  %v930_v5 = vld [vmem:[#allocation10 + $0x258] sm:$0xff] }
 0x381   :  { %v934_v6 = vld [vmem:[#allocation10 + $0x278] sm:$0xff] }
 0x383   :  { %2622 = vmatpush1.bf16.msra.mxu0 %v3935_v28  ;;  %2581 = vmatpush1.bf16.msra.mxu1 %v4061_v29  ;;  %v3991_v28 = vcombine.low %v1009_v11, %v1013_v12  ;;  %v3865_v29 = vcombine.low %v882_v14, %v886_v16  ;;  %v1065_v11 = vld [vmem:[#allocation10 + $0x690] sm:$0xff]  ;;  %v938_v14 = vld [vmem:[#allocation10 + $0x298] sm:$0xff] }
 0x384   :  { %2623 = vmatprep.subr.bf16.mxu0 %v3944_v31  ;;  %2582 = vmatprep.subr.bf16.mxu1 %v4070_v32  ;;  %v4000_v31 = vcombine.high %v1017_v23, %v1021_v24  ;;  %v1069_v12 = vld [vmem:[#allocation10 + $0x6b0] sm:$0xff]  ;;  %v942_v16 = vld [vmem:[#allocation10 + $0x2b8] sm:$0xff] }
 0x387   :  { %2624 = vmatpush1.bf16.msra.mxu0 %v3943_v26  ;;  %2583 = vmatpush1.bf16.msra.mxu1 %v4069_v30  ;;  %v3999_v26 = vcombine.low %v1017_v23, %v1021_v24  ;;  %v1073_v23 = vld [vmem:[#allocation10 + $0x6d0] sm:$0xff] }
 0x388   :  { %2625 = vmatprep.subr.bf16.mxu0 %v3952_v36  ;;  %2584 = vmatprep.subr.bf16.mxu1 %v4078_v37  ;;  %v4008_v36 = vcombine.high %v1025_v33, %v1029_v34  ;;  %v3882_v37 = vcombine.high %v898_v35, %v902_v25  ;;  %v1077_v24 = vld [vmem:[#allocation10 + $0x6f0] sm:$0xff] }
 0x38b   :  { %2626 = vmatpush1.bf16.msra.mxu0 %v3951_v43  ;;  %2585 = vmatpush1.bf16.msra.mxu1 %v4077_v44  ;;  %v4007_v43 = vcombine.low %v1025_v33, %v1029_v34  ;;  %v3881_v44 = vcombine.low %v898_v35, %v902_v25  ;;  %v1081_v33 = vld [vmem:[#allocation10 + $0x710] sm:$0xff]  ;;  %v954_v35 = vld [vmem:[#allocation10 + $0x318] sm:$0xff] }
 0x38c   :  { %2627 = vmatprep.subr.bf16.mxu0 %v3960_v45  ;;  %2586 = vmatprep.subr.bf16.mxu1 %v4086_v46  ;;  %v4016_v45 = vcombine.high %v1033_v38, %v1037_v3  ;;  %v3890_v46 = vcombine.high %v906_v39, %v910_v41  ;;  %v1085_v34 = vld [vmem:[#allocation10 + $0x730] sm:$0xff]  ;;  %v958_v25 = vld [vmem:[#allocation10 + $0x338] sm:$0xff] }
 0x38f   :  { %2628 = vmatpush1.bf16.msra.mxu0 %v3959_v51  ;;  %2587 = vmatpush1.bf16.msra.mxu1 %v4085_v52  ;;  %v4015_v51 = vcombine.low %v1033_v38, %v1037_v3  ;;  %v3889_v52 = vcombine.low %v906_v39, %v910_v41  ;;  %v1089_v38 = vld [vmem:[#allocation10 + $0x750] sm:$0xff]  ;;  %v962_v39 = vld [vmem:[#allocation10 + $0x358] sm:$0xff] }
 0x390   :  { %2638 = vmatprep.subr.bf16.mxu0 %v3968_v53  ;;  %2679 = vmatprep.subr.bf16.mxu1 %v3842_v54  ;;  %v4024_v53 = vcombine.high %v1041_v47, %v1045_v48  ;;  %v3898_v54 = vcombine.high %v914_v49, %v918_v50  ;;  %v1093_v3 = vld [vmem:[#allocation10 + $0x770] sm:$0xff]  ;;  %v966_v41 = vld [vmem:[#allocation10 + $0x378] sm:$0xff] }
 0x392   :  { %2630 = vmatmul.mubr.bf16.vlgmr.msra.gmra.mrb[8].mxu0 %v4984_v18  ;;  %2589 = vmatmul.mubr.bf16.vlgmr.msra.gmra.mrb[16].mxu1 %v5002_v42 }
 0x393   :  { %2639 = vmatpush1.bf16.msra.mxu0 %v3967_v62  ;;  %2670 = vmatprep.mubr.bf16.mxu0 %v5000_v40  ;;  %v4023_v62 = vcombine.low %v1041_v47, %v1045_v48  ;;  %v1097_v47 = vld [vmem:[#allocation10 + $0x790] sm:$0xff] }
 0x394   :  { %2680 = vmatpush1.bf16.msra.mxu1 %v3841_v0  ;;  %2711 = vmatprep.mubr.bf16.mxu1 %v4982_v17  ;;  %v890_v17 = vld [vmem:[#allocation10 + $0x118] sm:$0xff]  ;;  %v3897_v0 = vcombine.low %v914_v49, %v918_v50  ;;  %v1101_v48 = vld [vmem:[#allocation10 + $0x7b0] sm:$0xff] }
 0x395   :  { %2640 = vmatprep.subr.bf16.mxu0 %v3976_v58  ;;  %2681 = vmatprep.subr.bf16.mxu1 %v3850_v59  ;;  %v3874_v32 = vcombine.high %v890_v17, %v894_v27  ;;  %v3873_v30 = vcombine.low %v890_v17, %v894_v27  ;;  %v4032_v58 = vcombine.high %v1049_v55, %v1053_v56  ;;  %v946_v17 = vld [vmem:[#allocation10 + $0x2d8] sm:$0xff] }
 0x396   :  { %v3906_v59 = vcombine.high %v922_v57, %v926_v61  ;;  %v950_v27 = vld [vmem:[#allocation10 + $0x2f8] sm:$0xff] }
 0x397   :  { %2641 = vmatpush1.bf16.msra.mxu0 %v3975_v7  ;;  %v4031_v7 = vcombine.low %v1049_v55, %v1053_v56  ;;  %v970_v49 = vld [vmem:[#allocation10 + $0x398] sm:$0xff]  ;;  %v1105_v55 = vld [vmem:[#allocation10 + $0x7d0] sm:$0xff] }
 0x398   :  { %2682 = vmatpush1.bf16.msra.mxu1 %v3849_v8  ;;  %2642 = vmatprep.subr.bf16.mxu0 %v3984_v9  ;;  %v3905_v8 = vcombine.low %v922_v57, %v926_v61  ;;  %v4040_v9 = vcombine.high %v1057_v60, %v1061_v63  ;;  %v974_v50 = vld [vmem:[#allocation10 + $0x3b8] sm:$0xff]  ;;  %v1109_v56 = vld [vmem:[#allocation10 + $0x7f0] sm:$0xff] }
 0x399   :  { %2683 = vmatprep.subr.bf16.mxu1 %v3858_v10  ;;  %v3914_v10 = vcombine.high %v930_v5, %v934_v6  ;;  %v978_v57 = vld [vmem:[#allocation10 + $0x3d8] sm:$0xff] }
 0x39a   :  { %v982_v61 = vld [vmem:[#allocation10 + $0x3f8] sm:$0xff] }
 0x39b   :  { %2643 = vmatpush1.bf16.msra.mxu0 %v3983_v19  ;;  %v4039_v19 = vcombine.low %v1057_v60, %v1061_v63  ;;  %v986_v60 = vld [vmem:[#allocation10 + $0x418] sm:$0xff] }
 0x39c   :  { %2684 = vmatpush1.bf16.msra.mxu1 %v3857_v20  ;;  %2644 = vmatprep.subr.bf16.mxu0 %v3992_v21  ;;  %v3913_v20 = vcombine.low %v930_v5, %v934_v6  ;;  %v4048_v21 = vcombine.high %v1065_v11, %v1069_v12  ;;  %v990_v63 = vld [vmem:[#allocation10 + $0x438] sm:$0xff]  ;;  %v4087_v5 = vcombine.low %v1105_v55, %v1109_v56 }
 0x39d   :  { %2685 = vmatprep.subr.bf16.mxu1 %v3866_v22  ;;  %v3922_v22 = vcombine.high %v938_v14, %v942_v16  ;;  %v3961_v6 = vcombine.low %v978_v57, %v982_v61 }
 0x39f   :  { %2645 = vmatpush1.bf16.msra.mxu0 %v3991_v28  ;;  %v4047_v28 = vcombine.low %v1065_v11, %v1069_v12  ;;  %v4414_v11 = vld [vmem:[#allocation11] ss:$8 sps:$4 sm:$0xff]   ;;  %v3969_v12 = vcombine.low %v986_v60, %v990_v63 }
 0x3a0   :  { %2686 = vmatpush1.bf16.msra.mxu1 %v3865_v29  ;;  %2646 = vmatprep.subr.bf16.mxu0 %v4000_v31  ;;  %v3921_v29 = vcombine.low %v938_v14, %v942_v16  ;;  %v4056_v31 = vcombine.high %v1073_v23, %v1077_v24  ;;  %v4419_v16 = vld [vmem:[#allocation11 + $0x14] ss:$8 sps:$4 sm:$0xff]  }
 0x3a1   :  { %2687 = vmatprep.subr.bf16.mxu1 %v3874_v32  ;;  %v3930_v32 = vcombine.high %v946_v17, %v950_v27 }
 0x3a3   :  { %2647 = vmatpush1.bf16.msra.mxu0 %v3999_v26  ;;  %v4055_v26 = vcombine.low %v1073_v23, %v1077_v24  ;;  %v4422_v23 = vld [vmem:[#allocation11 + $0x24] ss:$8 sps:$4 sm:$0xff]  }
 0x3a4   :  { %2688 = vmatpush1.bf16.msra.mxu1 %v3873_v30  ;;  %2648 = vmatprep.subr.bf16.mxu0 %v4008_v36  ;;  %v3929_v30 = vcombine.low %v946_v17, %v950_v27  ;;  %v4064_v36 = vcombine.high %v1081_v33, %v1085_v34  ;;  %v1010_v17 = vld [vmem:[#allocation10 + $0x4d8] sm:$0xff] }
 0x3a5   :  { %2689 = vmatprep.subr.bf16.mxu1 %v3882_v37  ;;  %v3938_v37 = vcombine.high %v954_v35, %v958_v25  ;;  %v1014_v27 = vld [vmem:[#allocation10 + $0x4f8] sm:$0xff] }
 0x3a7   :  { %2649 = vmatpush1.bf16.msra.mxu0 %v4007_v43  ;;  %v4063_v43 = vcombine.low %v1081_v33, %v1085_v34  ;;  %v1022_v33 = vld [vmem:[#allocation10 + $0x538] sm:$0xff] }
 0x3a8   :  { %2690 = vmatpush1.bf16.msra.mxu1 %v3881_v44  ;;  %2650 = vmatprep.subr.bf16.mxu0 %v4016_v45  ;;  %v3937_v44 = vcombine.low %v954_v35, %v958_v25  ;;  %v4072_v45 = vcombine.high %v1089_v38, %v1093_v3  ;;  %v4423_v34 = vld [vmem:[#allocation11 + $0x30] ss:$8 sps:$4 sm:$0xff]   ;;  %v4428_v35 = vld [vmem:[#allocation11 + $0x44] ss:$8 sps:$4 sm:$0xff]  }
 0x3a9   :  { %2691 = vmatprep.subr.bf16.mxu1 %v3890_v46  ;;  %v3946_v46 = vcombine.high %v962_v39, %v966_v41 }
 0x3ab   :  { %2651 = vmatpush1.bf16.msra.mxu0 %v4015_v51  ;;  %v4071_v51 = vcombine.low %v1089_v38, %v1093_v3  ;;  %v4431_v38 = vld [vmem:[#allocation11 + $0x54] ss:$8 sps:$4 sm:$0xff]  }
 0x3ac   :  { %2692 = vmatpush1.bf16.msra.mxu1 %v3889_v52  ;;  %2652 = vmatprep.subr.bf16.mxu0 %v4024_v53  ;;  %v3945_v52 = vcombine.low %v962_v39, %v966_v41  ;;  %v4080_v53 = vcombine.high %v1097_v47, %v1101_v48  ;;  %v1034_v39 = vld [vmem:[#allocation10 + $0x598] sm:$0xff] }
 0x3ad   :  { %2693 = vmatprep.subr.bf16.mxu1 %v3898_v54  ;;  %v3954_v54 = vcombine.high %v970_v49, %v974_v50  ;;  %v1038_v41 = vld [vmem:[#allocation10 + $0x5b8] sm:$0xff] }
 0x3af   :  { %2653 = vmatpush1.bf16.msra.mxu0 %v4023_v62  ;;  %v4079_v62 = vcombine.low %v1097_v47, %v1101_v48  ;;  %v4018_v47 = vcombine.high %v1034_v39, %v1038_v41 }
 0x3b0   :  { %2694 = vmatpush1.bf16.msra.mxu1 %v3897_v0  ;;  %2654 = vmatprep.subr.bf16.mxu0 %v4032_v58  ;;  %v3953_v0 = vcombine.low %v970_v49, %v974_v50  ;;  %v4088_v58 = vcombine.high %v1105_v55, %v1109_v56  ;;  %v1042_v49 = vld [vmem:[#allocation10 + $0x5d8] sm:$0xff] }
 0x3b1   :  { %2695 = vmatprep.subr.bf16.mxu1 %v3906_v59  ;;  %v3962_v59 = vcombine.high %v978_v57, %v982_v61  ;;  %v1046_v50 = vld [vmem:[#allocation10 + $0x5f8] sm:$0xff] }
 0x3b2   :  { %v4437_v55 = vld [vmem:[#allocation11 + $0x74] ss:$8 sps:$4 sm:$0xff]   ;;  %v4026_v56 = vcombine.high %v1042_v49, %v1046_v50 }
 0x3b3   :  { %2655 = vmatpush1.bf16.msra.mxu0 %v4031_v7  ;;  %v4416_v7 = vld [vmem:[#allocation11 + $0x4] ss:$8 sps:$4 sm:$0xff]   ;;  %v1050_v57 = vld [vmem:[#allocation10 + $0x618] sm:$0xff] }
 0x3b4   :  { %2696 = vmatpush1.bf16.msra.mxu1 %v3905_v8  ;;  %2656 = vmatprep.subr.bf16.mxu0 %v4040_v9  ;;  %v3970_v8 = vcombine.high %v986_v60, %v990_v63  ;;  %v994_v9 = vld [vmem:[#allocation10 + $0x458] sm:$0xff] }
 0x3b5   :  { %2697 = vmatprep.subr.bf16.mxu1 %v3914_v10  ;;  %v998_v10 = vld [vmem:[#allocation10 + $0x478] sm:$0xff] }
 0x3b6   :  { %v3978_v14 = vcombine.high %v994_v9, %v998_v10  ;;  %v1054_v61 = vld [vmem:[#allocation10 + $0x638] sm:$0xff] }
 0x3b7   :  { %2657 = vmatpush1.bf16.msra.mxu0 %v4039_v19  ;;  %v1002_v19 = vld [vmem:[#allocation10 + $0x498] sm:$0xff] }
 0x3b8   :  { %2698 = vmatpush1.bf16.msra.mxu1 %v3913_v20  ;;  %2658 = vmatprep.subr.bf16.mxu0 %v4048_v21  ;;  %v1006_v20 = vld [vmem:[#allocation10 + $0x4b8] sm:$0xff] }
 0x3b9   :  { %2699 = vmatprep.subr.bf16.mxu1 %v3922_v22  ;;  %v4417_v21 = vld [vmem:[#allocation11 + $0x10] ss:$8 sps:$4 sm:$0xff]   ;;  %v3977_v22 = vcombine.low %v994_v9, %v998_v10  ;;  %v3986_v24 = vcombine.high %v1002_v19, %v1006_v20 }
 0x3ba   :  { %v1058_v60 = vld [vmem:[#allocation10 + $0x658] sm:$0xff] }
 0x3bb   :  { %2659 = vmatpush1.bf16.msra.mxu0 %v4047_v28  ;;  %v4420_v28 = vld [vmem:[#allocation11 + $0x20] ss:$8 sps:$4 sm:$0xff]   ;;  %v1062_v63 = vld [vmem:[#allocation10 + $0x678] sm:$0xff] }
 0x3bc   :  { %2700 = vmatpush1.bf16.msra.mxu1 %v3921_v29  ;;  %2660 = vmatprep.subr.bf16.mxu0 %v4056_v31  ;;  %v3985_v29 = vcombine.low %v1002_v19, %v1006_v20  ;;  %v4425_v31 = vld [vmem:[#allocation11 + $0x34] ss:$8 sps:$4 sm:$0xff]  }
 0x3bd   :  { %2701 = vmatprep.subr.bf16.mxu1 %v3930_v32  ;;  %v1018_v32 = vld [vmem:[#allocation10 + $0x518] sm:$0xff] }
 0x3be   :  { %v4002_v25 = vcombine.high %v1018_v32, %v1022_v33  ;;  %v1066_v9 = vld [vmem:[#allocation10 + $0x698] sm:$0xff] }
 0x3bf   :  { %2661 = vmatpush1.bf16.msra.mxu0 %v4055_v26  ;;  %v1026_v26 = vld [vmem:[#allocation10 + $0x558] sm:$0xff] }
 0x3c0   :  { %2702 = vmatpush1.bf16.msra.mxu1 %v3929_v30  ;;  %2662 = vmatprep.subr.bf16.mxu0 %v4064_v36  ;;  %v1030_v30 = vld [vmem:[#allocation10 + $0x578] sm:$0xff]  ;;  %v4426_v36 = vld [vmem:[#allocation11 + $0x40] ss:$8 sps:$4 sm:$0xff]  }
 0x3c1   :  { %2703 = vmatprep.subr.bf16.mxu1 %v3938_v37  ;;  %v4001_v37 = vcombine.low %v1018_v32, %v1022_v33  ;;  %v4010_v3 = vcombine.high %v1026_v26, %v1030_v30  ;;  %v1070_v10 = vld [vmem:[#allocation10 + $0x6b8] sm:$0xff] }
 0x3c2   :  { %v1074_v19 = vld [vmem:[#allocation10 + $0x6d8] sm:$0xff] }
 0x3c3   :  { %2663 = vmatpush1.bf16.msra.mxu0 %v4063_v43  ;;  %v4429_v43 = vld [vmem:[#allocation11 + $0x50] ss:$8 sps:$4 sm:$0xff]  }
 0x3c4   :  { %2704 = vmatpush1.bf16.msra.mxu1 %v3937_v44  ;;  %2664 = vmatprep.subr.bf16.mxu0 %v4072_v45  ;;  %v4009_v44 = vcombine.low %v1026_v26, %v1030_v30  ;;  %v4434_v45 = vld [vmem:[#allocation11 + $0x64] ss:$8 sps:$4 sm:$0xff]   ;;  %v1078_v20 = vld [vmem:[#allocation10 + $0x6f8] sm:$0xff] }
 0x3c5   :  { %2705 = vmatprep.subr.bf16.mxu1 %v3946_v46  ;;  %v1090_v32 = vld [vmem:[#allocation10 + $0x758] sm:$0xff] }
 0x3c6   :  { %v1094_v33 = vld [vmem:[#allocation10 + $0x778] sm:$0xff] }
 0x3c7   :  { %2665 = vmatpush1.bf16.msra.mxu0 %v4071_v51  ;;  %v1098_v26 = vld [vmem:[#allocation10 + $0x798] sm:$0xff] }
 0x3c8   :  { %2706 = vmatpush1.bf16.msra.mxu1 %v3945_v52  ;;  %2666 = vmatprep.subr.bf16.mxu0 %v4080_v53  ;;  %v4432_v52 = vld [vmem:[#allocation11 + $0x60] ss:$8 sps:$4 sm:$0xff]   ;;  %v1102_v30 = vld [vmem:[#allocation10 + $0x7b8] sm:$0xff] }
 0x3c9   :  { %2707 = vmatprep.subr.bf16.mxu1 %v3954_v54  ;;  %v4017_v54 = vcombine.low %v1034_v39, %v1038_v41  ;;  %v1106_v39 = vld [vmem:[#allocation10 + $0x7d8] sm:$0xff] }
 0x3ca   :  { %v1110_v41 = vld [vmem:[#allocation10 + $0x7f8] sm:$0xff] }
 0x3cb   :  { %2667 = vmatpush1.bf16.msra.mxu0 %v4079_v62  ;;  %v4435_v62 = vld [vmem:[#allocation11 + $0x70] ss:$8 sps:$4 sm:$0xff]  }
 0x3cc   :  { %2708 = vmatpush1.bf16.msra.mxu1 %v3953_v0  ;;  %2668 = vmatprep.subr.bf16.mxu0 %v4088_v58  ;;  %v4025_v0 = vcombine.low %v1042_v49, %v1046_v50  ;;  %v4440_v58 = vld [vmem:[#allocation11 + $0x84] ss:$8 sps:$4 sm:$0xff]   ;;  %v4459_v49 = vld [vmem:[#allocation11 + $0xf0] ss:$8 sps:$4 sm:$0xff]   ;;  %v4089_v50 = vcombine.low %v1106_v39, %v1110_v41 }
 0x3cd   :  { %2709 = vmatprep.subr.bf16.mxu1 %v3962_v59  ;;  %v4034_v59 = vcombine.high %v1050_v57, %v1054_v61 }
 0x3cf   :  { %2669 = vmatpush1.bf16.msra.mxu0 %v4087_v5  ;;  %v4438_v5 = vld [vmem:[#allocation11 + $0x80] ss:$8 sps:$4 sm:$0xff]  }
 0x3d0   :  { %2710 = vmatpush1.bf16.msra.mxu1 %v3961_v6  ;;  %3557 = vmatprep.subr.bf16.mxu0 %v4416_v7  ;;  %v4033_v6 = vcombine.low %v1050_v57, %v1054_v61  ;;  %v4443_v7 = vld [vmem:[#allocation11 + $0x94] ss:$8 sps:$4 sm:$0xff]  }
 0x3d1   :  { %2720 = vmatprep.subr.bf16.mxu1 %v3970_v8  ;;  %v4042_v8 = vcombine.high %v1058_v60, %v1062_v63 }
 0x3d2   :  { %2671 = vmatmul.mubr.bf16.vlgmr.msra.gmra.mrb[8].mxu0 %v5002_v42 }
 0x3d3   :  { %2712 = vmatmul.mubr.bf16.vlgmr.msra.gmra.mrb[20].mxu1 %v4984_v18  ;;  %3558 = vmatpush1.bf16.msra.mxu0 %v4414_v11  ;;  %v3994_v18 = vcombine.high %v1010_v17, %v1014_v27  ;;  %v4441_v11 = vld [vmem:[#allocation11 + $0x90] ss:$8 sps:$4 sm:$0xff]  }
 0x3d4   :  { %2721 = vmatpush1.bf16.msra.mxu1 %v3969_v12  ;;  %2752 = vmatprep.mubr.bf16.mxu1 %v5000_v40  ;;  %v3993_v40 = vcombine.low %v1010_v17, %v1014_v27  ;;  %v4041_v12 = vcombine.low %v1058_v60, %v1062_v63  ;;  %v1082_v17 = vld [vmem:[#allocation10 + $0x718] sm:$0xff] }
 0x3d5   :  { %2722 = vmatprep.subr.bf16.mxu1 %v3978_v14  ;;  %3559 = vmatprep.subr.bf16.mxu0 %v4419_v16  ;;  %v4446_v14 = vld [vmem:[#allocation11 + $0xa4] ss:$8 sps:$4 sm:$0xff]   ;;  %v4050_v16 = vcombine.high %v1066_v9, %v1070_v10  ;;  %v1086_v27 = vld [vmem:[#allocation10 + $0x738] sm:$0xff] }
 0x3d7   :  { %3560 = vmatpush1.bf16.msra.mxu0 %v4417_v21  ;;  %v4444_v21 = vld [vmem:[#allocation11 + $0xa0] ss:$8 sps:$4 sm:$0xff]  }
 0x3d8   :  { %2723 = vmatpush1.bf16.msra.mxu1 %v3977_v22  ;;  %3561 = vmatprep.subr.bf16.mxu0 %v4422_v23  ;;  %v4049_v22 = vcombine.low %v1066_v9, %v1070_v10  ;;  %v4449_v23 = vld [vmem:[#allocation11 + $0xb4] ss:$8 sps:$4 sm:$0xff]   ;;  %v4471_v10 = vld [vmem:[#allocation11 + $0x130] ss:$8 sps:$4 sm:$0xff]  }
 0x3d9   :  { %2724 = vmatprep.subr.bf16.mxu1 %v3986_v24  ;;  %v4058_v24 = vcombine.high %v1074_v19, %v1078_v20  ;;  %v4473_v9 = vld [vmem:[#allocation11 + $0x134] ss:$8 sps:$4 sm:$0xff]  }
 0x3db   :  { %3562 = vmatpush1.bf16.msra.mxu0 %v4420_v28  ;;  %v4447_v28 = vld [vmem:[#allocation11 + $0xb0] ss:$8 sps:$4 sm:$0xff]  }
 0x3dc   :  { %2725 = vmatpush1.bf16.msra.mxu1 %v3985_v29  ;;  %3563 = vmatprep.subr.bf16.mxu0 %v4425_v31  ;;  %v4057_v29 = vcombine.low %v1074_v19, %v1078_v20  ;;  %v4452_v31 = vld [vmem:[#allocation11 + $0xc4] ss:$8 sps:$4 sm:$0xff]   ;;  %v4480_v20 = vld [vmem:[#allocation11 + $0x160] ss:$8 sps:$4 sm:$0xff]  }
 0x3dd   :  { %2726 = vmatprep.subr.bf16.mxu1 %v3994_v18  ;;  %v4066_v18 = vcombine.high %v1082_v17, %v1086_v27  ;;  %v4482_v19 = vld [vmem:[#allocation11 + $0x164] ss:$8 sps:$4 sm:$0xff]  }
 0x3df   :  { %3564 = vmatpush1.bf16.msra.mxu0 %v4423_v34  ;;  %v4450_v34 = vld [vmem:[#allocation11 + $0xc0] ss:$8 sps:$4 sm:$0xff]  }
 0x3e0   :  { %2727 = vmatpush1.bf16.msra.mxu1 %v3993_v40  ;;  %3565 = vmatprep.subr.bf16.mxu0 %v4428_v35  ;;  %v4065_v40 = vcombine.low %v1082_v17, %v1086_v27  ;;  %v4455_v35 = vld [vmem:[#allocation11 + $0xd4] ss:$8 sps:$4 sm:$0xff]   ;;  %v4489_v27 = vld [vmem:[#allocation11 + $0x190] ss:$8 sps:$4 sm:$0xff]  }
 0x3e1   :  { %2728 = vmatprep.subr.bf16.mxu1 %v4002_v25  ;;  %v4074_v25 = vcombine.high %v1090_v32, %v1094_v33  ;;  %v4491_v17 = vld [vmem:[#allocation11 + $0x194] ss:$8 sps:$4 sm:$0xff]  }
 0x3e3   :  { %3566 = vmatpush1.bf16.msra.mxu0 %v4426_v36  ;;  %v4453_v36 = vld [vmem:[#allocation11 + $0xd0] ss:$8 sps:$4 sm:$0xff]  }
 0x3e4   :  { %2729 = vmatpush1.bf16.msra.mxu1 %v4001_v37  ;;  %3567 = vmatprep.subr.bf16.mxu0 %v4431_v38  ;;  %v4073_v37 = vcombine.low %v1090_v32, %v1094_v33  ;;  %v4458_v38 = vld [vmem:[#allocation11 + $0xe4] ss:$8 sps:$4 sm:$0xff]   ;;  %v4498_v33 = vld [vmem:[#allocation11 + $0x1c0] ss:$8 sps:$4 sm:$0xff]  }
 0x3e5   :  { %v5019_v46 = vpop.f32.mrb[12].mxu1  ;;  %2730 = vmatprep.subr.bf16.mxu1 %v4010_v3  ;;  %v4082_v3 = vcombine.high %v1098_v26, %v1102_v30  ;;  %v4500_v32 = vld [vmem:[#allocation11 + $0x1c4] ss:$8 sps:$4 sm:$0xff]  }
 0x3e6   :  { %v5021_v48 = vpop.f32.mrb[13].mxu1 }
 0x3e7   :  { %v2471_v51 = vpop.f32.mrb[14].mxu1  ;;  %3568 = vmatpush1.bf16.msra.mxu0 %v4429_v43  ;;  %v4456_v43 = vld [vmem:[#allocation11 + $0xe0] ss:$8 sps:$4 sm:$0xff]  }
 0x3e8   :  { %2731 = vmatpush1.bf16.msra.mxu1 %v4009_v44  ;;  %v2472_v53 = vpop.f32.mrb[15].mxu1  ;;  %3569 = vmatprep.subr.bf16.mxu0 %v4434_v45  ;;  %v4081_v44 = vcombine.low %v1098_v26, %v1102_v30  ;;  %v4461_v45 = vld [vmem:[#allocation11 + $0xf4] ss:$8 sps:$4 sm:$0xff]   ;;  %v4464_v51 = vld [vmem:[#allocation11 + $0x104] ss:$8 sps:$4 sm:$0xff]  }
 0x3e9   :  { %2732 = vmatprep.subr.bf16.mxu1 %v4018_v47  ;;  %v4090_v47 = vcombine.high %v1106_v39, %v1110_v41  ;;  %v4504_v26 = vld [vmem:[#allocation11 + $0x1e0] ss:$8 sps:$4 sm:$0xff]  }
 0x3eb   :  { %3570 = vmatpush1.bf16.msra.mxu0 %v4432_v52  ;;  %v5027_v52 = vld [vmem:[%s5074_s8] sm:$0xff] }
 0x3ec   :  { %2733 = vmatpush1.bf16.msra.mxu1 %v4017_v54  ;;  %3571 = vmatprep.subr.bf16.mxu0 %v4437_v55  ;;  %v1116_v53 = vrot.slane %v5027_v52, %v4943_v2  ;;  %v1120_v54 = vrot.slane %v5027_v52, %v4949_v4  ;;  %v1128_v30 = vrot.slane %v5027_v52, %v439_v15  ;;  %v4515_v15 = vld [vmem:[#allocation11 + $0x214] ss:$8 sps:$4 sm:$0xff]  }
 0x3ed   :  { %2734 = vmatprep.subr.bf16.mxu1 %v4026_v56 }
 0x3ee   :  { %v2468_v55 = vadd.f32 %v5019_v46, %v1116_v53  ;;  %v2470_v56 = vadd.f32 %v5021_v48, %v1120_v54  ;;  %v4470_v46 = vld [vmem:[#allocation11 + $0x124] ss:$8 sps:$4 sm:$0xff]   ;;  %v4468_v48 = vld [vmem:[#allocation11 + $0x120] ss:$8 sps:$4 sm:$0xff]   ;;  %v4513_v53 = vld [vmem:[#allocation11 + $0x210] ss:$8 sps:$4 sm:$0xff]  }
 0x3ef   :  { %3572 = vmatpush1.bf16.msra.mxu0 %v4435_v62  ;;  %v4518_v54 = vld [vmem:[#allocation11 + $0x224] ss:$8 sps:$4 sm:$0xff]  }
 0x3f0   :  { %2735 = vmatpush1.bf16.msra.mxu1 %v4025_v0  ;;  %3573 = vmatprep.subr.bf16.mxu0 %v4440_v58 }
 0x3f1   :  { %2736 = vmatprep.subr.bf16.mxu1 %v4034_v59 }
 0x3f3   :  { %3574 = vmatpush1.bf16.msra.mxu0 %v4438_v5  ;;  %v4462_v5 = vld [vmem:[#allocation11 + $0x100] ss:$8 sps:$4 sm:$0xff]  }
 0x3f4   :  { %2737 = vmatpush1.bf16.msra.mxu1 %v4033_v6  ;;  %3575 = vmatprep.subr.bf16.mxu0 %v4443_v7  ;;  %v4467_v7 = vld [vmem:[#allocation11 + $0x114] ss:$8 sps:$4 sm:$0xff]  }
 0x3f5   :  { %2738 = vmatprep.subr.bf16.mxu1 %v4042_v8  ;;  %v4465_v8 = vld [vmem:[#allocation11 + $0x110] ss:$8 sps:$4 sm:$0xff]  }
 0x3f7   :  { %3576 = vmatpush1.bf16.msra.mxu0 %v4441_v11  ;;  %v4476_v11 = vld [vmem:[#allocation11 + $0x144] ss:$8 sps:$4 sm:$0xff]  }
 0x3f8   :  { %2739 = vmatpush1.bf16.msra.mxu1 %v4041_v12  ;;  %3577 = vmatprep.subr.bf16.mxu0 %v4446_v14  ;;  %v4474_v12 = vld [vmem:[#allocation11 + $0x140] ss:$8 sps:$4 sm:$0xff]   ;;  %v4479_v14 = vld [vmem:[#allocation11 + $0x154] ss:$8 sps:$4 sm:$0xff]  }
 0x3f9   :  { %2740 = vmatprep.subr.bf16.mxu1 %v4050_v16  ;;  %v4477_v16 = vld [vmem:[#allocation11 + $0x150] ss:$8 sps:$4 sm:$0xff]  }
 0x3fb   :  { %3578 = vmatpush1.bf16.msra.mxu0 %v4444_v21  ;;  %v4485_v21 = vld [vmem:[#allocation11 + $0x174] ss:$8 sps:$4 sm:$0xff]  }
 0x3fc   :  { %2741 = vmatpush1.bf16.msra.mxu1 %v4049_v22  ;;  %3579 = vmatprep.subr.bf16.mxu0 %v4449_v23  ;;  %v4483_v22 = vld [vmem:[#allocation11 + $0x170] ss:$8 sps:$4 sm:$0xff]   ;;  %v4488_v23 = vld [vmem:[#allocation11 + $0x184] ss:$8 sps:$4 sm:$0xff]  }
 0x3fd   :  { %2742 = vmatprep.subr.bf16.mxu1 %v4058_v24  ;;  %v4486_v24 = vld [vmem:[#allocation11 + $0x180] ss:$8 sps:$4 sm:$0xff]  }
 0x3ff   :  { %3580 = vmatpush1.bf16.msra.mxu0 %v4447_v28  ;;  %v4494_v28 = vld [vmem:[#allocation11 + $0x1a4] ss:$8 sps:$4 sm:$0xff]  }
 0x400   :  { %2743 = vmatpush1.bf16.msra.mxu1 %v4057_v29  ;;  %3581 = vmatprep.subr.bf16.mxu0 %v4452_v31  ;;  %v4492_v29 = vld [vmem:[#allocation11 + $0x1a0] ss:$8 sps:$4 sm:$0xff]   ;;  %v4497_v31 = vld [vmem:[#allocation11 + $0x1b4] ss:$8 sps:$4 sm:$0xff]  }
 0x401   :  { %2744 = vmatprep.subr.bf16.mxu1 %v4066_v18  ;;  %v4495_v18 = vld [vmem:[#allocation11 + $0x1b0] ss:$8 sps:$4 sm:$0xff]  }
 0x403   :  { %3582 = vmatpush1.bf16.msra.mxu0 %v4450_v34  ;;  %v4503_v34 = vld [vmem:[#allocation11 + $0x1d4] ss:$8 sps:$4 sm:$0xff]  }
 0x404   :  { %2745 = vmatpush1.bf16.msra.mxu1 %v4065_v40  ;;  %3583 = vmatprep.subr.bf16.mxu0 %v4455_v35  ;;  %v4501_v40 = vld [vmem:[#allocation11 + $0x1d0] ss:$8 sps:$4 sm:$0xff]   ;;  %v4506_v35 = vld [vmem:[#allocation11 + $0x1e4] ss:$8 sps:$4 sm:$0xff]  }
 0x405   :  { %2746 = vmatprep.subr.bf16.mxu1 %v4074_v25  ;;  %v1124_v25 = vrot.slane %v5027_v52, %v435_v13 }
 0x407   :  { %3584 = vmatpush1.bf16.msra.mxu0 %v4453_v36  ;;  %v4509_v36 = vld [vmem:[#allocation11 + $0x1f4] ss:$8 sps:$4 sm:$0xff]  }
 0x408   :  { %2747 = vmatpush1.bf16.msra.mxu1 %v4073_v37  ;;  %3585 = vmatprep.subr.bf16.mxu0 %v4458_v38 }
 0x409   :  { %2748 = vmatprep.subr.bf16.mxu1 %v4082_v3 }
 0x40b   :  { %3586 = vmatpush1.bf16.msra.mxu0 %v4456_v43  ;;  %v4507_v43 = vld [vmem:[#allocation11 + $0x1f0] ss:$8 sps:$4 sm:$0xff]  }
 0x40c   :  { %2749 = vmatpush1.bf16.msra.mxu1 %v4081_v44  ;;  %3587 = vmatprep.subr.bf16.mxu0 %v4461_v45 }
 0x40d   :  { %2750 = vmatprep.subr.bf16.mxu1 %v4090_v47  ;;  %v4512_v47 = vld [vmem:[#allocation11 + $0x204] ss:$8 sps:$4 sm:$0xff]  }
 0x40f   :  { %3588 = vmatpush1.bf16.msra.mxu0 %v4459_v49 }
 0x410   :  { %2751 = vmatpush1.bf16.msra.mxu1 %v4089_v50  ;;  %3598 = vmatprep.subr.bf16.mxu0 %v4464_v51  ;;  %v4510_v50 = vld [vmem:[#allocation11 + $0x200] ss:$8 sps:$4 sm:$0xff]  }
 0x413   :  { %2753 = vmatmul.mubr.bf16.vlgmr.msra.gmra.mrb[20].mxu1 %v5002_v42 }
 0x425   :  { %v2508_v57 = vpop.f32.mrb[4].mxu0 }
 0x426   :  { %v2509_v61 = vadd.f32 %v2508_v57, %v2468_v55  ;;  %v2510_v62 = vpop.f32.mrb[5].mxu0  ;;  %v4516_v55 = vld [vmem:[#allocation11 + $0x220] ss:$8 sps:$4 sm:$0xff]   ;;  %v4519_v57 = vld [vmem:[#allocation11 + $0x230] ss:$8 sps:$4 sm:$0xff]  }
 0x427   :  { %v2511_v0 = vadd.f32 %v2510_v62, %v2470_v56  ;;  %v2512_v42 = vpop.f32.mrb[6].mxu0  ;;  %v4521_v56 = vld [vmem:[#allocation11 + $0x234] ss:$8 sps:$4 sm:$0xff]   ;;  %v4522_v62 = vld [vmem:[#allocation11 + $0x240] ss:$8 sps:$4 sm:$0xff]  }
 0x428   :  { %v2761_v58 = vmax.f32 %v2509_v61, 0.0  ;;  %v2513_v59 = vpop.f32.mrb[7].mxu0  ;;  %v4524_v61 = vld [vmem:[#allocation11 + $0x244] ss:$8 sps:$4 sm:$0xff]   ;;  %v4525_v42 = vld [vmem:[#allocation11 + $0x250] ss:$8 sps:$4 sm:$0xff]  }
 0x429   :  { %v2762_v60 = vmax.f32 %v2511_v0, 0.0  ;;  %v4527_v0 = vld [vmem:[#allocation11 + $0x254] ss:$8 sps:$4 sm:$0xff]   ;;  %v4528_v59 = vld [vmem:[#allocation11 + $0x260] ss:$8 sps:$4 sm:$0xff]  }
 0x42a   :  { %v2769_v6 = vpack.c.bf16 %v2761_v58, %v2761_v58  ;;  %v4530_v58 = vld [vmem:[#allocation11 + $0x264] ss:$8 sps:$4 sm:$0xff]  }
 0x42b   :  { %v2770_v63 = vpack.c.bf16 %v2762_v60, %v2762_v60  ;;  %v4533_v60 = vld [vmem:[#allocation11 + $0x274] ss:$8 sps:$4 sm:$0xff]  }
 0x42d   :  { %3589 = vmatprep.mubr.bf16.mxu0 %v2770_v63  ;;  %v4531_v63 = vld [vmem:[#allocation11 + $0x270] ss:$8 sps:$4 sm:$0xff]  }
 0x42e   :  { %3590 = vmatmul.mubr.bf16.vlgmr.msra.gmra.mrb[12].mxu0 %v2769_v6  ;;  %v4534_v6 = vld [vmem:[#allocation11 + $0x280] ss:$8 sps:$4 sm:$0xff]  }
 0x42f   :  { %3599 = vmatpush1.bf16.msra.mxu0 %v4462_v5  ;;  %v4536_v5 = vld [vmem:[#allocation11 + $0x284] ss:$8 sps:$4 sm:$0xff]  }
 0x430   :  { %3600 = vmatprep.subr.bf16.mxu0 %v4467_v7  ;;  %v4539_v7 = vld [vmem:[#allocation11 + $0x294] ss:$8 sps:$4 sm:$0xff]  }
 0x433   :  { %3601 = vmatpush1.bf16.msra.mxu0 %v4465_v8  ;;  %v4537_v8 = vld [vmem:[#allocation11 + $0x290] ss:$8 sps:$4 sm:$0xff]  }
 0x434   :  { %3602 = vmatprep.subr.bf16.mxu0 %v4470_v46  ;;  %v4542_v46 = vld [vmem:[#allocation11 + $0x2a4] ss:$8 sps:$4 sm:$0xff]  }
 0x437   :  { %3603 = vmatpush1.bf16.msra.mxu0 %v4468_v48  ;;  %v4540_v48 = vld [vmem:[#allocation11 + $0x2a0] ss:$8 sps:$4 sm:$0xff]  }
 0x438   :  { %3604 = vmatprep.subr.bf16.mxu0 %v4473_v9  ;;  %v4545_v9 = vld [vmem:[#allocation11 + $0x2b4] ss:$8 sps:$4 sm:$0xff]  }
 0x43b   :  { %3605 = vmatpush1.bf16.msra.mxu0 %v4471_v10  ;;  %v4543_v10 = vld [vmem:[#allocation11 + $0x2b0] ss:$8 sps:$4 sm:$0xff]  }
 0x43c   :  { %3606 = vmatprep.subr.bf16.mxu0 %v4476_v11  ;;  %v4548_v11 = vld [vmem:[#allocation11 + $0x2c4] ss:$8 sps:$4 sm:$0xff]  }
 0x43f   :  { %3607 = vmatpush1.bf16.msra.mxu0 %v4474_v12  ;;  %v4546_v12 = vld [vmem:[#allocation11 + $0x2c0] ss:$8 sps:$4 sm:$0xff]  }
 0x440   :  { %3608 = vmatprep.subr.bf16.mxu0 %v4479_v14  ;;  %v4551_v14 = vld [vmem:[#allocation11 + $0x2d4] ss:$8 sps:$4 sm:$0xff]  }
 0x443   :  { %3609 = vmatpush1.bf16.msra.mxu0 %v4477_v16  ;;  %v1131_v16 = vsub.s32 4, %v4940_v1 }
 0x444   :  { %3610 = vmatprep.subr.bf16.mxu0 %v4482_v19  ;;  %v4549_v19 = vld [vmem:[#allocation11 + $0x2d0] ss:$8 sps:$4 sm:$0xff]  }
 0x447   :  { %3611 = vmatpush1.bf16.msra.mxu0 %v4480_v20  ;;  %v1135_v20 = vsub.s32 5, %v4940_v1 }
 0x448   :  { %3612 = vmatprep.subr.bf16.mxu0 %v4485_v21  ;;  %v4554_v21 = vld [vmem:[#allocation11 + $0x2e4] ss:$8 sps:$4 sm:$0xff]  }
 0x44b   :  { %3613 = vmatpush1.bf16.msra.mxu0 %v4483_v22  ;;  %v1132_v22 = vrot.slane %v5027_v52, %v1131_v16 }
 0x44c   :  { %3614 = vmatprep.subr.bf16.mxu0 %v4488_v23  ;;  %v1136_v23 = vrot.slane %v5027_v52, %v1135_v20 }
 0x44f   :  { %3615 = vmatpush1.bf16.msra.mxu0 %v4486_v24  ;;  %v4552_v24 = vld [vmem:[#allocation11 + $0x2e0] ss:$8 sps:$4 sm:$0xff]  }
 0x450   :  { %3616 = vmatprep.subr.bf16.mxu0 %v4491_v17  ;;  %v4557_v17 = vld [vmem:[#allocation11 + $0x2f4] ss:$8 sps:$4 sm:$0xff]  }
 0x453   :  { %3617 = vmatpush1.bf16.msra.mxu0 %v4489_v27 }
 0x454   :  { %3618 = vmatprep.subr.bf16.mxu0 %v4494_v28 }
 0x457   :  { %3619 = vmatpush1.bf16.msra.mxu0 %v4492_v29 }
 0x458   :  { %3620 = vmatprep.subr.bf16.mxu0 %v4497_v31 }
 0x45b   :  { %3621 = vmatpush1.bf16.msra.mxu0 %v4495_v18 }
 0x45c   :  { %3622 = vmatprep.subr.bf16.mxu0 %v4500_v32  ;;  %v4555_v32 = vld [vmem:[#allocation11 + $0x2f0] ss:$8 sps:$4 sm:$0xff]  }
 0x45f   :  { %3623 = vmatpush1.bf16.msra.mxu0 %v4498_v33 }
 0x460   :  { %3624 = vmatprep.subr.bf16.mxu0 %v4503_v34 }
 0x463   :  { %3625 = vmatpush1.bf16.msra.mxu0 %v4501_v40  ;;  %v4560_v40 = vld [vmem:[#allocation11 + $0x304] ss:$8 sps:$4 sm:$0xff]  }
 0x464   :  { %3626 = vmatprep.subr.bf16.mxu0 %v4506_v35 }
 0x465   :  { %v2590_v37 = vpop.f32.mrb[16].mxu1 }
 0x466   :  { %v4240_v38 = vadd.f32 %v2590_v37, %v1124_v25  ;;  %v2592_v3 = vpop.f32.mrb[17].mxu1  ;;  %v4561_v37 = vld [vmem:[#allocation11 + $0x310] ss:$8 sps:$4 sm:$0xff]  }
 0x467   :  { %v4241_v39 = vadd.f32 %v2592_v3, %v1128_v30  ;;  %3627 = vmatpush1.bf16.msra.mxu0 %v4504_v26  ;;  %v2594_v41 = vpop.f32.mrb[18].mxu1  ;;  %v4558_v26 = vld [vmem:[#allocation11 + $0x300] ss:$8 sps:$4 sm:$0xff]  }
 0x468   :  { %v2763_v44 = vmax.f32 %v4240_v38, 0.0  ;;  %v2595_v45 = vpop.f32.mrb[19].mxu1  ;;  %3628 = vmatprep.subr.bf16.mxu0 %v4509_v36  ;;  %v4563_v36 = vld [vmem:[#allocation11 + $0x314] ss:$8 sps:$4 sm:$0xff]   ;;  %v4566_v38 = vld [vmem:[#allocation11 + $0x324] ss:$8 sps:$4 sm:$0xff]  }
 0x469   :  { %v2764_v13 = vmax.f32 %v4241_v39, 0.0  ;;  %v4564_v3 = vld [vmem:[#allocation11 + $0x320] ss:$8 sps:$4 sm:$0xff]   ;;  %v4569_v39 = vld [vmem:[#allocation11 + $0x334] ss:$8 sps:$4 sm:$0xff]  }
 0x46a   :  { %v2771_v51 = vpack.c.bf16 %v2763_v44, %v2763_v44  ;;  %v4567_v41 = vld [vmem:[#allocation11 + $0x330] ss:$8 sps:$4 sm:$0xff]   ;;  %v4570_v44 = vld [vmem:[#allocation11 + $0x340] ss:$8 sps:$4 sm:$0xff]   ;;  %v4575_v45 = vld [vmem:[#allocation11 + $0x354] ss:$8 sps:$4 sm:$0xff]  }
 0x46b   :  { %v2772_v49 = vpack.c.bf16 %v2764_v13, %v2764_v13  ;;  %3629 = vmatpush1.bf16.msra.mxu0 %v4507_v43  ;;  %v4572_v43 = vld [vmem:[#allocation11 + $0x344] ss:$8 sps:$4 sm:$0xff]  }
 0x46c   :  { %3639 = vmatprep.subr.bf16.mxu0 %v4512_v47  ;;  %v4573_v47 = vld [vmem:[#allocation11 + $0x350] ss:$8 sps:$4 sm:$0xff]   ;;  %v4578_v13 = vld [vmem:[#allocation11 + $0x364] ss:$8 sps:$4 sm:$0xff]  }
 0x46d   :  { %3630 = vmatprep.mubr.bf16.mxu0 %v2772_v49  ;;  %v4576_v49 = vld [vmem:[#allocation11 + $0x360] ss:$8 sps:$4 sm:$0xff]  }
 0x46e   :  { %3631 = vmatmul.mubr.bf16.vlgmr.msra.gmra.mrb[12].mxu0 %v2771_v51  ;;  %v4579_v51 = vld [vmem:[#allocation11 + $0x370] ss:$8 sps:$4 sm:$0xff]  }
 0x46f   :  { %3640 = vmatpush1.bf16.msra.mxu0 %v4510_v50  ;;  %v4581_v50 = vld [vmem:[#allocation11 + $0x374] ss:$8 sps:$4 sm:$0xff]  }
 0x470   :  { %3641 = vmatprep.subr.bf16.mxu0 %v4515_v15  ;;  %v4584_v15 = vld [vmem:[#allocation11 + $0x384] ss:$8 sps:$4 sm:$0xff]  }
 0x473   :  { %3642 = vmatpush1.bf16.msra.mxu0 %v4513_v53  ;;  %v4582_v53 = vld [vmem:[#allocation11 + $0x380] ss:$8 sps:$4 sm:$0xff]  }
 0x474   :  { %3643 = vmatprep.subr.bf16.mxu0 %v4518_v54  ;;  %v4587_v54 = vld [vmem:[#allocation11 + $0x394] ss:$8 sps:$4 sm:$0xff]  }
 0x477   :  { %3644 = vmatpush1.bf16.msra.mxu0 %v4516_v55  ;;  %v4585_v55 = vld [vmem:[#allocation11 + $0x390] ss:$8 sps:$4 sm:$0xff]  }
 0x478   :  { %3645 = vmatprep.subr.bf16.mxu0 %v4521_v56  ;;  %v4590_v56 = vld [vmem:[#allocation11 + $0x3a4] ss:$8 sps:$4 sm:$0xff]  }
 0x47b   :  { %3646 = vmatpush1.bf16.msra.mxu0 %v4519_v57  ;;  %v4588_v57 = vld [vmem:[#allocation11 + $0x3a0] ss:$8 sps:$4 sm:$0xff]  }
 0x47c   :  { %3647 = vmatprep.subr.bf16.mxu0 %v4524_v61  ;;  %v4593_v61 = vld [vmem:[#allocation11 + $0x3b4] ss:$8 sps:$4 sm:$0xff]  }
 0x47f   :  { %3648 = vmatpush1.bf16.msra.mxu0 %v4522_v62  ;;  %v4591_v62 = vld [vmem:[#allocation11 + $0x3b0] ss:$8 sps:$4 sm:$0xff]  }
 0x480   :  { %3649 = vmatprep.subr.bf16.mxu0 %v4527_v0  ;;  %v4596_v0 = vld [vmem:[#allocation11 + $0x3c4] ss:$8 sps:$4 sm:$0xff]  }
 0x483   :  { %3650 = vmatpush1.bf16.msra.mxu0 %v4525_v42  ;;  %v4594_v42 = vld [vmem:[#allocation11 + $0x3c0] ss:$8 sps:$4 sm:$0xff]  }
 0x484   :  { %3651 = vmatprep.subr.bf16.mxu0 %v4530_v58  ;;  %v4599_v58 = vld [vmem:[#allocation11 + $0x3d4] ss:$8 sps:$4 sm:$0xff]  }
 0x487   :  { %3652 = vmatpush1.bf16.msra.mxu0 %v4528_v59  ;;  %v4597_v59 = vld [vmem:[#allocation11 + $0x3d0] ss:$8 sps:$4 sm:$0xff]  }
 0x488   :  { %3653 = vmatprep.subr.bf16.mxu0 %v4533_v60  ;;  %v1139_v60 = vsub.s32 6, %v4940_v1 }
 0x48b   :  { %3654 = vmatpush1.bf16.msra.mxu0 %v4531_v63  ;;  %v1143_v63 = vsub.s32 7, %v4940_v1 }
 0x48c   :  { %3655 = vmatprep.subr.bf16.mxu0 %v4536_v5  ;;  %v4602_v5 = vld [vmem:[#allocation11 + $0x3e4] ss:$8 sps:$4 sm:$0xff]  }
 0x48f   :  { %3656 = vmatpush1.bf16.msra.mxu0 %v4534_v6  ;;  %v1140_v6 = vrot.slane %v5027_v52, %v1139_v60 }
 0x490   :  { %3657 = vmatprep.subr.bf16.mxu0 %v4539_v7  ;;  %v4600_v7 = vld [vmem:[#allocation11 + $0x3e0] ss:$8 sps:$4 sm:$0xff]  }
 0x493   :  { %3658 = vmatpush1.bf16.msra.mxu0 %v4537_v8  ;;  %v1144_v8 = vrot.slane %v5027_v52, %v1143_v63  ;;  %v2905_v52 = vld [vmem:[%s5076_s10] sm:$0x3]  ;;  %s4742_s10 = scalar_lea.vmem %s3738_s19, 256 }
 0x494   :  { %3659 = vmatprep.subr.bf16.mxu0 %v4542_v46  ;;  %v4605_v46 = vld [vmem:[#allocation11 + $0x3f4] ss:$8 sps:$4 sm:$0xff]   ;;  %p4743_p6 = scmp.ne.s32.totalorder %s3738_s19, %s4742_s10  ;;  %p4748_p8 = scmp.lt.s32.totalorder %s4742_s10, %s4742_s10 }
 0x496   :  { %p4749_p9 = por %p4748_p8, %p4747_p7 }
 0x497   :  { %3660 = vmatpush1.bf16.msra.mxu0 %v4540_v48 }
 0x498   :  { %3661 = vmatprep.subr.bf16.mxu0 %v4545_v9  ;;  %p4750_p10 = pnand %p4749_p9, %p4743_p6 }
 0x49b   :  { %3662 = vmatpush1.bf16.msra.mxu0 %v4543_v10 }
 0x49c   :  { %3663 = vmatprep.subr.bf16.mxu0 %v4548_v11  ;;  %v4603_v11 = vld [vmem:[#allocation11 + $0x3f0] ss:$8 sps:$4 sm:$0xff]  }
 0x49f   :  { %3664 = vmatpush1.bf16.msra.mxu0 %v4546_v12 }
 0x4a0   :  { %3665 = vmatprep.subr.bf16.mxu0 %v4551_v14 }
 0x4a3   :  { %3666 = vmatpush1.bf16.msra.mxu0 %v4549_v19 }
 0x4a4   :  { %3667 = vmatprep.subr.bf16.mxu0 %v4554_v21 }
 0x4a5   :  { %v2672_v27 = vpop.f32.mrb[8].mxu0 }
 0x4a6   :  { %v4242_v28 = vadd.f32 %v2672_v27, %v1132_v22  ;;  %v2674_v29 = vpop.f32.mrb[9].mxu0  ;;  %v2910_v22 = vrot.slane %v2905_v52, %v4943_v2 }
 0x4a7   :  { %v4243_v31 = vadd.f32 %v2674_v29, %v1136_v23  ;;  %v2676_v18 = vpop.f32.mrb[10].mxu0  ;;  %3668 = vmatpush1.bf16.msra.mxu0 %v4552_v24  ;;  %v2914_v23 = vrot.slane %v2905_v52, %v4949_v4 }
 0x4a8   :  { %v2765_v33 = vmax.f32 %v4242_v28, 0.0  ;;  %v2677_v34 = vpop.f32.mrb[11].mxu0  ;;  %3669 = vmatprep.subr.bf16.mxu0 %v4557_v17 }
 0x4a9   :  { %v2766_v35 = vmax.f32 %v4243_v31, 0.0 }
 0x4aa   :  { %v2773_v30 = vpack.c.bf16 %v2765_v33, %v2765_v33 }
 0x4ab   :  { %v2774_v25 = vpack.c.bf16 %v2766_v35, %v2766_v35  ;;  %3670 = vmatpush1.bf16.msra.mxu0 %v4555_v32 }
 0x4ac   :  { %3680 = vmatprep.subr.bf16.mxu0 %v4560_v40 }
 0x4ad   :  { %3671 = vmatprep.mubr.bf16.mxu0 %v2774_v25 }
 0x4ae   :  { %3672 = vmatmul.mubr.bf16.vlgmr.msra.gmra.mrb[12].mxu0 %v2773_v30 }
 0x4af   :  { %3681 = vmatpush1.bf16.msra.mxu0 %v4558_v26 }
 0x4b0   :  { %3682 = vmatprep.subr.bf16.mxu0 %v4563_v36 }
 0x4b3   :  { %3683 = vmatpush1.bf16.msra.mxu0 %v4561_v37 }
 0x4b4   :  { %3684 = vmatprep.subr.bf16.mxu0 %v4566_v38 }
 0x4b7   :  { %3685 = vmatpush1.bf16.msra.mxu0 %v4564_v3 }
 0x4b8   :  { %3686 = vmatprep.subr.bf16.mxu0 %v4569_v39 }
 0x4bb   :  { %3687 = vmatpush1.bf16.msra.mxu0 %v4567_v41 }
 0x4bc   :  { %3688 = vmatprep.subr.bf16.mxu0 %v4572_v43 }
 0x4bf   :  { %3689 = vmatpush1.bf16.msra.mxu0 %v4570_v44 }
 0x4c0   :  { %3690 = vmatprep.subr.bf16.mxu0 %v4575_v45 }
 0x4c3   :  { %3691 = vmatpush1.bf16.msra.mxu0 %v4573_v47 }
 0x4c4   :  { %3692 = vmatprep.subr.bf16.mxu0 %v4578_v13 }
 0x4c7   :  { %3693 = vmatpush1.bf16.msra.mxu0 %v4576_v49 }
 0x4c8   :  { %3694 = vmatprep.subr.bf16.mxu0 %v4581_v50 }
 0x4cb   :  { %3695 = vmatpush1.bf16.msra.mxu0 %v4579_v51 }
 0x4cc   :  { %3696 = vmatprep.subr.bf16.mxu0 %v4584_v15 }
 0x4cf   :  { %3697 = vmatpush1.bf16.msra.mxu0 %v4582_v53 }
 0x4d0   :  { %3698 = vmatprep.subr.bf16.mxu0 %v4587_v54 }
 0x4d3   :  { %3699 = vmatpush1.bf16.msra.mxu0 %v4585_v55 }
 0x4d4   :  { %3700 = vmatprep.subr.bf16.mxu0 %v4590_v56 }
 0x4d7   :  { %3701 = vmatpush1.bf16.msra.mxu0 %v4588_v57 }
 0x4d8   :  { %3702 = vmatprep.subr.bf16.mxu0 %v4593_v61 }
 0x4db   :  { %3703 = vmatpush1.bf16.msra.mxu0 %v4591_v62 }
 0x4dc   :  { %3704 = vmatprep.subr.bf16.mxu0 %v4596_v0 }
 0x4df   :  { %3705 = vmatpush1.bf16.msra.mxu0 %v4594_v42 }
 0x4e0   :  { %3706 = vmatprep.subr.bf16.mxu0 %v4599_v58 }
 0x4e3   :  { %3707 = vmatpush1.bf16.msra.mxu0 %v4597_v59 }
 0x4e4   :  { %3708 = vmatprep.subr.bf16.mxu0 %v4602_v5 }
 0x4e6   :  { %v2754_v48 = vpop.f32.mrb[20].mxu1 }
 0x4e7   :  { %v4244_v9 = vadd.f32 %v2754_v48, %v1140_v6  ;;  %v2756_v10 = vpop.f32.mrb[21].mxu1  ;;  %3709 = vmatpush1.bf16.msra.mxu0 %v4600_v7 }
 0x4e8   :  { %v4245_v12 = vadd.f32 %v2756_v10, %v1144_v8  ;;  %v2758_v14 = vpop.f32.mrb[22].mxu1  ;;  %3710 = vmatprep.subr.bf16.mxu0 %v4605_v46 }
 0x4e9   :  { %v2767_v16 = vmax.f32 %v4244_v9, 0.0  ;;  %v2759_v19 = vpop.f32.mrb[23].mxu1 }
 0x4ea   :  { %v2768_v1 = vmax.f32 %v4245_v12, 0.0 }
 0x4eb   :  { %3711 = vmatpush1.bf16.msra.mxu0 %v4603_v11  ;;  %v2775_v21 = vpack.c.bf16 %v2767_v16, %v2767_v16 }
 0x4ec   :  { %v2776_v20 = vpack.c.bf16 %v2768_v1, %v2768_v1 }
 0x4ee   :  { %3712 = vmatprep.mubr.bf16.mxu0 %v2776_v20 }
 0x4ef   :  { %3713 = vmatmul.mubr.bf16.vlgmr.msra.gmra.mrb[12].mxu0 %v2775_v21 }
 0x5c2   :  { %v3714_v24 = vpop.f32.mrb[12].mxu0 }
 0x5c3   :  { %v4246_v17 = vadd.f32 %v3714_v24, %v2910_v22  ;;  %v3716_v27 = vpop.f32.mrb[13].mxu0 }
 0x5c4   :  { %v4247_v28 = vadd.f32 %v3716_v27, %v2914_v23  ;;  %v3718_v29 = vpop.f32.mrb[14].mxu0 }
 0x5c5   :  { %v3721_v31 = vmul.f32 0.5, %v4246_v17  ;;  %v3719_v18 = vpop.f32.mrb[15].mxu0 }
 0x5c6   :  { %v3722_v32 = vmul.f32 0.5, %v4247_v28 }
 0x5c7   :  { %4606 = vtanh.f32 %v3721_v31 }
 0x5c8   :  { %4608 = vtanh.f32 %v3722_v32 }
 0x5d1   :  { %v4607_v33 = vpop.eup %4606 }
 0x5d2   :  { %v4609_v34 = vpop.eup %4608  ;;  %v3725_v40 = vadd.f32 1.0, %v4607_v33 }
 0x5d3   :  { %v3726_v35 = vadd.f32 1.0, %v4609_v34 }
 0x5d4   :  { %v3727_v25 = vmul.f32 0.5, %v3725_v40 }
 0x5d5   :  { %v3728_v2 = vmul.f32 0.5, %v3726_v35 }
 0x5d6   :  { %3729 = vst [vmem:[#allocation13] sm:$0xff] %v3727_v25 }
 0x5d7   :  { %3730 = vst [vmem:[#allocation13 + $0x8] sm:$0xff] %v3728_v2 }
 0x5d8   :  { %4753 = shalt.err (!%p4750_p10)
}
 0x5d9   :  { %s4754_s28 = scalar_lea.hbm %s5077_s11, 256 }
 0x5da   :  { %p4755_p11 = scmp.ne.s32.totalorder %s5077_s11, %s4754_s28  ;;  %p4758_p12 = scmp.lt.u32.totalorder %s4754_s28, %s5077_s11 }
 0x5dc   :  { %p4760_p13 = pnand %p4758_p12, %p4755_p11 }
 0x5de   :  { %4763 = shalt.err (!%p4760_p13)
}
 0x5df   :  { %3740 = dma.vmem_to_hbm [thread:$0]  %s3738_s19, 256, %s5077_s11, [#allocation4]  }
 0x5e0   :  { %4772 = dma.done.wait [#allocation4], 256  }
 0x5e1   :  { %4773 = vsyncadd [#allocation4], 4294967040 }
 0x5e2   :  { %3744 = vsyncpa [#allocation3], 1 }
 0x5e3   :  { %3745 = vsyncpa [#allocation6], 1 }
 0x5e4   :  { %3746 = vsyncpa [#allocation9], 1 }
 0x5e5   :  { %3747 = vsyncpa [#allocation12], 1 }
 0x5e6   :  { %3748 = vsyncpa [#allocation4], 1 }

</bundles_post_ra>
